<compile_context>
chip_gen: v7x
topology: tpu7x:2x2x1
jax: 0.10.0
libtpu: 0.0.40
codegen_flags: <defaults>
</compile_context>

<pallas_src>
import functools

import jax
import jax.numpy as jnp
from jax.experimental import pallas as pl
from jax.experimental.pallas import tpu as pltpu

LRELU_SLOPE = 0.2
BN_EPS = 1e-5
VMEM_LIMIT = 32 * 1024 * 1024


# ---------------------------------------------------------------------------
# Pallas kernels (transposed matmul fused with the layer's post-op)
# ---------------------------------------------------------------------------
def _mm_bias_lrelu_kernel(w_ref, x_ref, b_ref, o_ref):
    # Conv2d(bias=True) + LeakyReLU(0.2).  bf16 operands, f32 accumulate.
    y = jnp.dot(w_ref[...], x_ref[...], preferred_element_type=jnp.float32)
    y = y + b_ref[...]                                   # (Cout, 1) broadcast over lanes
    o_ref[...] = jnp.where(y >= 0, y, LRELU_SLOPE * y).astype(o_ref.dtype)


def _mm_bn_lrelu_kernel(w_ref, x_ref, g_ref, be_ref, o_ref):
    # Conv2d(bias=False) + BatchNorm2d (training-mode batch stats, biased
    # variance, eps=1e-5) + LeakyReLU(0.2).  Single-pass stats: sum / sum-sq.
    y = jnp.dot(w_ref[...], x_ref[...], preferred_element_type=jnp.float32)  # (Cout, M)
    inv_m = 1.0 / y.shape[1]
    s1 = jnp.sum(y, axis=1, keepdims=True)
    s2 = jnp.sum(y * y, axis=1, keepdims=True)
    mean = s1 * inv_m
    var = s2 * inv_m - mean * mean                       # biased variance
    y = (y - mean) * jax.lax.rsqrt(var + BN_EPS) * g_ref[...] + be_ref[...]
    o_ref[...] = jnp.where(y >= 0, y, LRELU_SLOPE * y).astype(o_ref.dtype)


def _stable_sigmoid(s):
    # exp routed to the EUP, reciprocal to the EUP (approx), no inf path.
    e = jnp.exp(-jnp.abs(s))
    r = pl.reciprocal(1.0 + e, approx=True)
    return jnp.where(s >= 0, r, e * r)


def _tail_kernel(w4_ref, x4_ref, g_ref, be_ref, w5_ref, gsel_ref, b5_ref, o_ref):
    # Fused: conv4 + BN + LeakyReLU  ->  conv5(bias) + Sigmoid.
    y = jnp.dot(w4_ref[...], x4_ref[...], preferred_element_type=jnp.float32)  # (C4, M4)
    inv_m = 1.0 / y.shape[1]
    s1 = jnp.sum(y, axis=1, keepdims=True)
    s2 = jnp.sum(y * y, axis=1, keepdims=True)
    mean = s1 * inv_m
    var = s2 * inv_m - mean * mean
    y = (y - mean) * jax.lax.rsqrt(var + BN_EPS) * g_ref[...] + be_ref[...]
    y = jnp.where(y >= 0, y, LRELU_SLOPE * y)            # layer-4 output, (C4, M4) f32

    # Layer 5 (4x4 stride-2 pad-0 conv on a 4x4 map == full reduction per sample):
    #   out[n] = b5 + sum_{c,m} w5map[c, m] * y[c, m] * [m // 16 == n]
    prod = w5_ref[...] * y                                                   # (C4, M4)
    z = jnp.dot(prod, gsel_ref[...], preferred_element_type=jnp.float32)     # (C4, N)
    s = jnp.sum(z, axis=0, keepdims=True) + b5_ref[...]                      # (1, N)
    o_ref[...] = _stable_sigmoid(s)


# ---------------------------------------------------------------------------
# Glue: transposed im2col (one fused XLA gather) + pallas_call wrappers
# ---------------------------------------------------------------------------
def _im2col_t(x_cnhw, k, s, p):
    """Patches of a CNHW activation -> X:(k*k*C, N*Ho*Wo); K-order (kh,kw,c)."""
    C, N, H, W = x_cnhw.shape
    xp = jnp.pad(x_cnhw, ((0, 0), (0, 0), (p, p), (p, p)))
    Ho = (H + 2 * p - k) // s + 1
    Wo = (W + 2 * p - k) // s + 1
    cols = []
    for di in range(k):
        for dj in range(k):
            cols.append(xp[:, :, di:di + s * Ho:s, dj:dj + s * Wo:s])  # (C,N,Ho,Wo)
    X = jnp.stack(cols, axis=0)                                        # (k*k,C,N,Ho,Wo)
    return X.reshape(k * k * C, N * Ho * Wo), Ho, Wo


def _pick_tile(m):
    for t in (512, 256, 128):
        if m % t == 0:
            return t
    return m


def _conv_bias_lrelu(X, wt, b):
    """Layer 1: M-tiled grid, parallel across TensorCores, pipelined DMA."""
    Cout, K = wt.shape
    M = X.shape[1]
    TM = _pick_tile(M)
    return pl.pallas_call(
        _mm_bias_lrelu_kernel,
        out_shape=jax.ShapeDtypeStruct((Cout, M), jnp.bfloat16),
        grid=(M // TM,),
        in_specs=[
            pl.BlockSpec((Cout, K), lambda i: (0, 0)),    # weights resident
            pl.BlockSpec((K, TM), lambda i: (0, i)),      # stream M tiles
            pl.BlockSpec((Cout, 1), lambda i: (0, 0)),    # bias resident
        ],
        out_specs=pl.BlockSpec((Cout, TM), lambda i: (0, i)),
        compiler_params=pltpu.CompilerParams(
            dimension_semantics=("parallel",),
            vmem_limit_bytes=VMEM_LIMIT),
    )(wt, X, b)


def _conv_bn_lrelu(X, wt, g, be):
    """BN layers: whole-M block (training-mode BN needs full-batch stats)."""
    Cout, _ = wt.shape
    M = X.shape[1]
    vmem = pl.BlockSpec(memory_space=pltpu.MemorySpace.VMEM)
    return pl.pallas_call(
        _mm_bn_lrelu_kernel,
        out_shape=jax.ShapeDtypeStruct((Cout, M), jnp.bfloat16),
        in_specs=[vmem] * 4,
        out_specs=vmem,
        compiler_params=pltpu.CompilerParams(vmem_limit_bytes=VMEM_LIMIT),
    )(wt, X, g, be)


def _tail(X4, w4t, g4, be4, w5map, gsel, b5):
    """Fused layers 4+5 (+sigmoid)."""
    N = gsel.shape[1]
    vmem = pl.BlockSpec(memory_space=pltpu.MemorySpace.VMEM)
    return pl.pallas_call(
        _tail_kernel,
        out_shape=jax.ShapeDtypeStruct((1, N), jnp.float32),
        in_specs=[vmem] * 7,
        out_specs=vmem,
        compiler_params=pltpu.CompilerParams(vmem_limit_bytes=VMEM_LIMIT),
    )(w4t, X4, g4, be4, w5map, gsel, b5)


# ---------------------------------------------------------------------------
# Deterministic synthetic parameters (shapes follow the PyTorch module)
# ---------------------------------------------------------------------------
def _conv_wt(key, cin, cout, k):
    # PyTorch weight layout (Cout, Cin, kH, kW) -> lane-dense matmul layout
    # (Cout, kH*kW*Cin), stored in bf16 for the MXU.
    w = 0.02 * jax.random.normal(key, (cout, cin, k, k), jnp.float32)
    wt = jnp.transpose(w, (0, 2, 3, 1)).reshape(cout, k * k * cin)
    return wt.astype(jnp.bfloat16)


def init_params(key, channels_img, features):
    keys = jax.random.split(key, 12)
    f = features
    p = {}
    # layer 1: Conv2d(channels_img, f, 4, 2, 1) + LeakyReLU
    p["w1t"] = _conv_wt(keys[0], channels_img, f, 4)
    p["b1"] = 0.01 * jax.random.normal(keys[1], (f, 1), jnp.float32)
    # disc blocks 2..4: Conv(bias=False) + BN + LeakyReLU
    for i, (ci, co) in enumerate([(f, 2 * f), (2 * f, 4 * f), (4 * f, 8 * f)]):
        p[f"w{i + 2}t"] = _conv_wt(keys[2 + 3 * i], ci, co, 4)
        p[f"g{i + 2}"] = 1.0 + 0.01 * jax.random.normal(keys[3 + 3 * i], (co, 1), jnp.float32)
        p[f"be{i + 2}"] = 0.01 * jax.random.normal(keys[4 + 3 * i], (co, 1), jnp.float32)
    # layer 5: Conv2d(8f, 1, 4, 2, 0) + Sigmoid  (kept in PyTorch OIHW layout)
    p["w5"] = 0.02 * jax.random.normal(keys[11], (1, 8 * f, 4, 4), jnp.float32)
    p["b5"] = jnp.zeros((1, 1), jnp.float32)
    return p


# ---------------------------------------------------------------------------
# Forward pass (NCHW in, NCHW out, like PyTorch)
# ---------------------------------------------------------------------------
def discriminator_forward(params, x_nchw):
    N = x_nchw.shape[0]
    # NCHW -> CNHW + bf16; this transpose fuses into the im2col gather below.
    x = jnp.transpose(x_nchw, (1, 0, 2, 3)).astype(jnp.bfloat16)

    # layer 1: Conv + bias + LeakyReLU
    X, Ho, Wo = _im2col_t(x, 4, 2, 1)
    a = _conv_bias_lrelu(X, params["w1t"], params["b1"])
    x = a.reshape(a.shape[0], N, Ho, Wo)

    # layers 2-3: Conv + BatchNorm(batch stats) + LeakyReLU
    for i in (2, 3):
        X, Ho, Wo = _im2col_t(x, 4, 2, 1)
        a = _conv_bn_lrelu(X, params[f"w{i}t"], params[f"g{i}"], params[f"be{i}"])
        x = a.reshape(a.shape[0], N, Ho, Wo)

    # fused tail: layer 4 (Conv+BN+LReLU) + layer 5 (Conv+bias) + Sigmoid
    X4, Ho4, Wo4 = _im2col_t(x, 4, 2, 1)                 # (K4, N*Ho4*Wo4), Ho4=Wo4=4
    M4 = N * Ho4 * Wo4
    c4 = params["w4t"].shape[0]
    hw = Ho4 * Wo4
    w5map = jnp.tile(params["w5"].reshape(c4, hw), (1, N)).astype(jnp.float32)  # (C4, M4)
    gsel = (jnp.arange(M4)[:, None] // hw == jnp.arange(N)[None, :]).astype(jnp.float32)
    out = _tail(X4, params["w4t"], params["g4"], params["be4"],
                w5map, gsel, params["b5"])                # (1, N) f32
    return jnp.transpose(out, (1, 0)).reshape(N, 1, 1, 1)


# ---------------------------------------------------------------------------
# Pure-JAX reference (f32) with identical math, for a sanity check
# ---------------------------------------------------------------------------
def _reference_forward(params, x_nchw):
    x = x_nchw.astype(jnp.float32)

    def conv(y, wt, k, stride, pad):
        cout = wt.shape[0]
        cin = y.shape[1]
        w = wt.astype(jnp.float32).reshape(cout, k, k, cin).transpose(0, 3, 1, 2)
        return jax.lax.conv_general_dilated(
            y, w, (stride, stride), [(pad, pad), (pad, pad)],
            dimension_numbers=("NCHW", "OIHW", "NCHW"))

    def lrelu(y):
        return jnp.where(y >= 0, y, LRELU_SLOPE * y)

    def bn(y, g, be):
        mean = jnp.mean(y, axis=(0, 2, 3), keepdims=True)
        var = jnp.mean((y - mean) ** 2, axis=(0, 2, 3), keepdims=True)
        return ((y - mean) * jax.lax.rsqrt(var + BN_EPS) * g.reshape(1, -1, 1, 1)
                + be.reshape(1, -1, 1, 1))

    y = lrelu(conv(x, params["w1t"], 4, 2, 1) + params["b1"].reshape(1, -1, 1, 1))
    for i in (2, 3, 4):
        y = lrelu(bn(conv(y, params[f"w{i}t"], 4, 2, 1),
                     params[f"g{i}"], params[f"be{i}"]))
    y = jax.lax.conv_general_dilated(
        y, params["w5"], (2, 2), [(0, 0), (0, 0)],
        dimension_numbers=("NCHW", "OIHW", "NCHW"))
    return jax.nn.sigmoid(y + params["b5"].reshape(1, 1, 1, 1))


if __name__ == "__main__":
    key = jax.random.PRNGKey(0)
    kp, kx = jax.random.split(key)

    channels_img, features = 3, 8
    # DCGAN discriminator geometry requires 64x64 input (64->32->16->8->4->1).
    x = jax.random.normal(kx, (2, channels_img, 64, 64), jnp.float32)

    params = init_params(kp, channels_img, features)
    fwd = jax.jit(functools.partial(discriminator_forward, params))

    out = fwd(x)
    jax.block_until_ready(out)

    assert out.shape == (2, 1, 1, 1), out.shape
    assert bool(jnp.all(jnp.isfinite(out)))
    assert bool(jnp.all((out >= 0.0) & (out <= 1.0)))     # sigmoid range

    ref = _reference_forward(params, x)
    max_err = float(jnp.max(jnp.abs(out.astype(jnp.float32) - ref)))
    assert max_err < 0.1, max_err                          # bf16 activation path

    print("KERNEL_OK")
</pallas_src>

<mosaic_0001>
module attributes {stable_mosaic.version = 11 : i64} {
  func.func @_mm_bias_lrelu_kernel(%arg0: i32, %arg1: memref<8x48xbf16, #tpu.memory_space<vmem>>, %arg2: memref<48x512xbf16, #tpu.memory_space<vmem>>, %arg3: memref<8x1xf32, #tpu.memory_space<vmem>>, %arg4: memref<8x512xbf16, #tpu.memory_space<vmem>>) attributes {dimension_semantics = [#tpu.dimension_semantics<parallel>], iteration_bounds = array<i64: 4>, scalar_prefetch = 0 : i64, scratch_operands = 0 : i64, tpu.core_type = #tpu.core_type<tc>, window_params = [{pipeline_mode = #tpu.pipeline_mode<synchronous>, transform_indices = @transform_0, window_bounds = array<i64: 8, 48>}, {transform_indices = @transform_1, window_bounds = array<i64: 48, 512>}, {pipeline_mode = #tpu.pipeline_mode<synchronous>, transform_indices = @transform_2, window_bounds = array<i64: 8, 1>}, {transform_indices = @transform_3, window_bounds = array<i64: 8, 512>}]} {
    %c0 = arith.constant 0 : index
    %c0_0 = arith.constant 0 : index
    %0 = vector.load %arg1[%c0, %c0_0] : memref<8x48xbf16, #tpu.memory_space<vmem>>, vector<8x48xbf16>
    %c0_1 = arith.constant 0 : index
    %c0_2 = arith.constant 0 : index
    %1 = vector.load %arg2[%c0_1, %c0_2] : memref<48x512xbf16, #tpu.memory_space<vmem>>, vector<48x512xbf16>
    %cst = arith.constant dense<0.000000e+00> : vector<8x512xf32>
    %2 = tpu.matmul %0, %1, %cst {dimension_numbers = #tpu.dot_dimension_numbers<[1], [0], [0], [1], [0, 0, 1, 1], [], []>} : vector<8x48xbf16>, vector<48x512xbf16>, vector<8x512xf32> -> vector<8x512xf32>
    %c0_3 = arith.constant 0 : index
    %c0_4 = arith.constant 0 : index
    %3 = vector.load %arg3[%c0_3, %c0_4] : memref<8x1xf32, #tpu.memory_space<vmem>>, vector<8x1xf32>
    %4 = vector.broadcast %3 : vector<8x1xf32> to vector<8x512xf32>
    %5 = arith.addf %2, %4 : vector<8x512xf32>
    %cst_5 = arith.constant 0.000000e+00 : f32
    %6 = vector.broadcast %cst_5 : f32 to vector<8x512xf32>
    %7 = arith.cmpf oge, %5, %6 : vector<8x512xf32>
    %cst_6 = arith.constant 2.000000e-01 : f32
    %8 = vector.broadcast %cst_6 : f32 to vector<8x512xf32>
    %9 = arith.mulf %8, %5 : vector<8x512xf32>
    %10 = arith.select %7, %5, %9 : vector<8x512xi1>, vector<8x512xf32>
    %11 = arith.truncf %10 : vector<8x512xf32> to vector<8x512xbf16>
    %c0_7 = arith.constant 0 : index
    %c0_8 = arith.constant 0 : index
    %12 = vector.load %arg4[%c0_7, %c0_8] : memref<8x512xbf16, #tpu.memory_space<vmem>>, vector<8x512xbf16>
    tpu.vector_store %arg4[%c0_7, %c0_8], %11 {strides = array<i32>} : memref<8x512xbf16, #tpu.memory_space<vmem>>, vector<8x512xbf16>,
    return
  }
  func.func @transform_0(%arg0: i32) -> (i32, i32) {
    %c0_i32 = arith.constant 0 : i32
    %c0_i32_0 = arith.constant 0 : i32
    %c0_i32_1 = arith.constant 0 : i32
    return %c0_i32, %c0_i32_0 : i32, i32
  }
  func.func @transform_1(%arg0: i32) -> (i32, i32) {
    %c0_i32 = arith.constant 0 : i32
    %c0_i32_0 = arith.constant 0 : i32
    return %c0_i32, %arg0 : i32, i32
  }
  func.func @transform_2(%arg0: i32) -> (i32, i32) {
    %c0_i32 = arith.constant 0 : i32
    %c0_i32_0 = arith.constant 0 : i32
    %c0_i32_1 = arith.constant 0 : i32
    return %c0_i32, %c0_i32_0 : i32, i32
  }
  func.func @transform_3(%arg0: i32) -> (i32, i32) {
    %c0_i32 = arith.constant 0 : i32
    %c0_i32_0 = arith.constant 0 : i32
    return %c0_i32, %arg0 : i32, i32
  }
}

module attributes {stable_mosaic.version = 11 : i64} {
  func.func @_mm_bn_lrelu_kernel(%arg0: memref<16x128xbf16, #tpu.memory_space<vmem>>, %arg1: memref<128x512xbf16, #tpu.memory_space<vmem>>, %arg2: memref<16x1xf32, #tpu.memory_space<vmem>>, %arg3: memref<16x1xf32, #tpu.memory_space<vmem>>, %arg4: memref<16x512xbf16, #tpu.memory_space<vmem>>) attributes {dimension_semantics = [], scalar_prefetch = 0 : i64, scratch_operands = 0 : i64, tpu.core_type = #tpu.core_type<tc>} {
    %c0 = arith.constant 0 : index
    %c0_0 = arith.constant 0 : index
    %0 = vector.load %arg0[%c0, %c0_0] : memref<16x128xbf16, #tpu.memory_space<vmem>>, vector<16x128xbf16>
    %c0_1 = arith.constant 0 : index
    %c0_2 = arith.constant 0 : index
    %1 = vector.load %arg1[%c0_1, %c0_2] : memref<128x512xbf16, #tpu.memory_space<vmem>>, vector<128x512xbf16>
    %cst = arith.constant dense<0.000000e+00> : vector<16x512xf32>
    %2 = tpu.matmul %0, %1, %cst {dimension_numbers = #tpu.dot_dimension_numbers<[1], [0], [0], [1], [0, 0, 1, 1], [], []>} : vector<16x128xbf16>, vector<128x512xbf16>, vector<16x512xf32> -> vector<16x512xf32>
    %cst_3 = arith.constant dense<0.000000e+00> : vector<16xf32>
    %3 = vector.multi_reduction <add>, %2, %cst_3 [1] : vector<16x512xf32> to vector<16xf32>
    %4 = vector.shape_cast %3 : vector<16xf32> to vector<16x1xf32>
    %5 = arith.mulf %2, %2 : vector<16x512xf32>
    %cst_4 = arith.constant dense<0.000000e+00> : vector<16xf32>
    %6 = vector.multi_reduction <add>, %5, %cst_4 [1] : vector<16x512xf32> to vector<16xf32>
    %7 = vector.shape_cast %6 : vector<16xf32> to vector<16x1xf32>
    %cst_5 = arith.constant 0.001953125 : f32
    %8 = vector.broadcast %cst_5 : f32 to vector<16x1xf32>
    %9 = arith.mulf %4, %8 : vector<16x1xf32>
    %cst_6 = arith.constant 0.001953125 : f32
    %10 = vector.broadcast %cst_6 : f32 to vector<16x1xf32>
    %11 = arith.mulf %7, %10 : vector<16x1xf32>
    %12 = arith.mulf %9, %9 : vector<16x1xf32>
    %13 = arith.subf %11, %12 : vector<16x1xf32>
    %14 = vector.broadcast %9 : vector<16x1xf32> to vector<16x512xf32>
    %15 = arith.subf %2, %14 : vector<16x512xf32>
    %cst_7 = arith.constant 9.99999974E-6 : f32
    %16 = vector.broadcast %cst_7 : f32 to vector<16x1xf32>
    %17 = arith.addf %13, %16 : vector<16x1xf32>
    %18 = math.rsqrt %17 : vector<16x1xf32>
    %19 = vector.broadcast %18 : vector<16x1xf32> to vector<16x512xf32>
    %20 = arith.mulf %15, %19 : vector<16x512xf32>
    %c0_8 = arith.constant 0 : index
    %c0_9 = arith.constant 0 : index
    %21 = vector.load %arg2[%c0_8, %c0_9] : memref<16x1xf32, #tpu.memory_space<vmem>>, vector<16x1xf32>
    %22 = vector.broadcast %21 : vector<16x1xf32> to vector<16x512xf32>
    %23 = arith.mulf %20, %22 : vector<16x512xf32>
    %c0_10 = arith.constant 0 : index
    %c0_11 = arith.constant 0 : index
    %24 = vector.load %arg3[%c0_10, %c0_11] : memref<16x1xf32, #tpu.memory_space<vmem>>, vector<16x1xf32>
    %25 = vector.broadcast %24 : vector<16x1xf32> to vector<16x512xf32>
    %26 = arith.addf %23, %25 : vector<16x512xf32>
    %cst_12 = arith.constant 0.000000e+00 : f32
    %27 = vector.broadcast %cst_12 : f32 to vector<16x512xf32>
    %28 = arith.cmpf oge, %26, %27 : vector<16x512xf32>
    %cst_13 = arith.constant 2.000000e-01 : f32
    %29 = vector.broadcast %cst_13 : f32 to vector<16x512xf32>
    %30 = arith.mulf %29, %26 : vector<16x512xf32>
    %31 = arith.select %28, %26, %30 : vector<16x512xi1>, vector<16x512xf32>
    %32 = arith.truncf %31 : vector<16x512xf32> to vector<16x512xbf16>
    %c0_14 = arith.constant 0 : index
    %c0_15 = arith.constant 0 : index
    %33 = vector.load %arg4[%c0_14, %c0_15] : memref<16x512xbf16, #tpu.memory_space<vmem>>, vector<16x512xbf16>
    tpu.vector_store %arg4[%c0_14, %c0_15], %32 {strides = array<i32>} : memref<16x512xbf16, #tpu.memory_space<vmem>>, vector<16x512xbf16>,
    return
  }
}

module attributes {stable_mosaic.version = 11 : i64} {
  func.func @_mm_bn_lrelu_kernel(%arg0: memref<32x256xbf16, #tpu.memory_space<vmem>>, %arg1: memref<256x128xbf16, #tpu.memory_space<vmem>>, %arg2: memref<32x1xf32, #tpu.memory_space<vmem>>, %arg3: memref<32x1xf32, #tpu.memory_space<vmem>>, %arg4: memref<32x128xbf16, #tpu.memory_space<vmem>>) attributes {dimension_semantics = [], scalar_prefetch = 0 : i64, scratch_operands = 0 : i64, tpu.core_type = #tpu.core_type<tc>} {
    %c0 = arith.constant 0 : index
    %c0_0 = arith.constant 0 : index
    %0 = vector.load %arg0[%c0, %c0_0] : memref<32x256xbf16, #tpu.memory_space<vmem>>, vector<32x256xbf16>
    %c0_1 = arith.constant 0 : index
    %c0_2 = arith.constant 0 : index
    %1 = vector.load %arg1[%c0_1, %c0_2] : memref<256x128xbf16, #tpu.memory_space<vmem>>, vector<256x128xbf16>
    %cst = arith.constant dense<0.000000e+00> : vector<32x128xf32>
    %2 = tpu.matmul %0, %1, %cst {dimension_numbers = #tpu.dot_dimension_numbers<[1], [0], [0], [1], [0, 0, 1, 1], [], []>} : vector<32x256xbf16>, vector<256x128xbf16>, vector<32x128xf32> -> vector<32x128xf32>
    %cst_3 = arith.constant dense<0.000000e+00> : vector<32xf32>
    %3 = vector.multi_reduction <add>, %2, %cst_3 [1] : vector<32x128xf32> to vector<32xf32>
    %4 = vector.shape_cast %3 : vector<32xf32> to vector<32x1xf32>
    %5 = arith.mulf %2, %2 : vector<32x128xf32>
    %cst_4 = arith.constant dense<0.000000e+00> : vector<32xf32>
    %6 = vector.multi_reduction <add>, %5, %cst_4 [1] : vector<32x128xf32> to vector<32xf32>
    %7 = vector.shape_cast %6 : vector<32xf32> to vector<32x1xf32>
    %cst_5 = arith.constant 7.812500e-03 : f32
    %8 = vector.broadcast %cst_5 : f32 to vector<32x1xf32>
    %9 = arith.mulf %4, %8 : vector<32x1xf32>
    %cst_6 = arith.constant 7.812500e-03 : f32
    %10 = vector.broadcast %cst_6 : f32 to vector<32x1xf32>
    %11 = arith.mulf %7, %10 : vector<32x1xf32>
    %12 = arith.mulf %9, %9 : vector<32x1xf32>
    %13 = arith.subf %11, %12 : vector<32x1xf32>
    %14 = vector.broadcast %9 : vector<32x1xf32> to vector<32x128xf32>
    %15 = arith.subf %2, %14 : vector<32x128xf32>
    %cst_7 = arith.constant 9.99999974E-6 : f32
    %16 = vector.broadcast %cst_7 : f32 to vector<32x1xf32>
    %17 = arith.addf %13, %16 : vector<32x1xf32>
    %18 = math.rsqrt %17 : vector<32x1xf32>
    %19 = vector.broadcast %18 : vector<32x1xf32> to vector<32x128xf32>
    %20 = arith.mulf %15, %19 : vector<32x128xf32>
    %c0_8 = arith.constant 0 : index
    %c0_9 = arith.constant 0 : index
    %21 = vector.load %arg2[%c0_8, %c0_9] : memref<32x1xf32, #tpu.memory_space<vmem>>, vector<32x1xf32>
    %22 = vector.broadcast %21 : vector<32x1xf32> to vector<32x128xf32>
    %23 = arith.mulf %20, %22 : vector<32x128xf32>
    %c0_10 = arith.constant 0 : index
    %c0_11 = arith.constant 0 : index
    %24 = vector.load %arg3[%c0_10, %c0_11] : memref<32x1xf32, #tpu.memory_space<vmem>>, vector<32x1xf32>
    %25 = vector.broadcast %24 : vector<32x1xf32> to vector<32x128xf32>
    %26 = arith.addf %23, %25 : vector<32x128xf32>
    %cst_12 = arith.constant 0.000000e+00 : f32
    %27 = vector.broadcast %cst_12 : f32 to vector<32x128xf32>
    %28 = arith.cmpf oge, %26, %27 : vector<32x128xf32>
    %cst_13 = arith.constant 2.000000e-01 : f32
    %29 = vector.broadcast %cst_13 : f32 to vector<32x128xf32>
    %30 = arith.mulf %29, %26 : vector<32x128xf32>
    %31 = arith.select %28, %26, %30 : vector<32x128xi1>, vector<32x128xf32>
    %32 = arith.truncf %31 : vector<32x128xf32> to vector<32x128xbf16>
    %c0_14 = arith.constant 0 : index
    %c0_15 = arith.constant 0 : index
    %33 = vector.load %arg4[%c0_14, %c0_15] : memref<32x128xbf16, #tpu.memory_space<vmem>>, vector<32x128xbf16>
    tpu.vector_store %arg4[%c0_14, %c0_15], %32 {strides = array<i32>} : memref<32x128xbf16, #tpu.memory_space<vmem>>, vector<32x128xbf16>,
    return
  }
}

module attributes {stable_mosaic.version = 11 : i64} {
  func.func @_tail_kernel(%arg0: memref<64x512xbf16, #tpu.memory_space<vmem>>, %arg1: memref<512x32xbf16, #tpu.memory_space<vmem>>, %arg2: memref<64x1xf32, #tpu.memory_space<vmem>>, %arg3: memref<64x1xf32, #tpu.memory_space<vmem>>, %arg4: memref<64x32xf32, #tpu.memory_space<vmem>>, %arg5: memref<32x2xf32, #tpu.memory_space<vmem>>, %arg6: memref<1x1xf32, #tpu.memory_space<vmem>>, %arg7: memref<1x2xf32, #tpu.memory_space<vmem>>) attributes {dimension_semantics = [], scalar_prefetch = 0 : i64, scratch_operands = 0 : i64, tpu.core_type = #tpu.core_type<tc>} {
    %c0 = arith.constant 0 : index
    %c0_0 = arith.constant 0 : index
    %0 = vector.load %arg0[%c0, %c0_0] : memref<64x512xbf16, #tpu.memory_space<vmem>>, vector<64x512xbf16>
    %c0_1 = arith.constant 0 : index
    %c0_2 = arith.constant 0 : index
    %1 = vector.load %arg1[%c0_1, %c0_2] : memref<512x32xbf16, #tpu.memory_space<vmem>>, vector<512x32xbf16>
    %cst = arith.constant dense<0.000000e+00> : vector<64x32xf32>
    %2 = tpu.matmul %0, %1, %cst {dimension_numbers = #tpu.dot_dimension_numbers<[1], [0], [0], [1], [0, 0, 1, 1], [], []>} : vector<64x512xbf16>, vector<512x32xbf16>, vector<64x32xf32> -> vector<64x32xf32>
    %cst_3 = arith.constant dense<0.000000e+00> : vector<64xf32>
    %3 = vector.multi_reduction <add>, %2, %cst_3 [1] : vector<64x32xf32> to vector<64xf32>
    %4 = vector.shape_cast %3 : vector<64xf32> to vector<64x1xf32>
    %5 = arith.mulf %2, %2 : vector<64x32xf32>
    %cst_4 = arith.constant dense<0.000000e+00> : vector<64xf32>
    %6 = vector.multi_reduction <add>, %5, %cst_4 [1] : vector<64x32xf32> to vector<64xf32>
    %7 = vector.shape_cast %6 : vector<64xf32> to vector<64x1xf32>
    %cst_5 = arith.constant 3.125000e-02 : f32
    %8 = vector.broadcast %cst_5 : f32 to vector<64x1xf32>
    %9 = arith.mulf %4, %8 : vector<64x1xf32>
    %cst_6 = arith.constant 3.125000e-02 : f32
    %10 = vector.broadcast %cst_6 : f32 to vector<64x1xf32>
    %11 = arith.mulf %7, %10 : vector<64x1xf32>
    %12 = arith.mulf %9, %9 : vector<64x1xf32>
    %13 = arith.subf %11, %12 : vector<64x1xf32>
    %14 = vector.broadcast %9 : vector<64x1xf32> to vector<64x32xf32>
    %15 = arith.subf %2, %14 : vector<64x32xf32>
    %cst_7 = arith.constant 9.99999974E-6 : f32
    %16 = vector.broadcast %cst_7 : f32 to vector<64x1xf32>
    %17 = arith.addf %13, %16 : vector<64x1xf32>
    %18 = math.rsqrt %17 : vector<64x1xf32>
    %19 = vector.broadcast %18 : vector<64x1xf32> to vector<64x32xf32>
    %20 = arith.mulf %15, %19 : vector<64x32xf32>
    %c0_8 = arith.constant 0 : index
    %c0_9 = arith.constant 0 : index
    %21 = vector.load %arg2[%c0_8, %c0_9] : memref<64x1xf32, #tpu.memory_space<vmem>>, vector<64x1xf32>
    %22 = vector.broadcast %21 : vector<64x1xf32> to vector<64x32xf32>
    %23 = arith.mulf %20, %22 : vector<64x32xf32>
    %c0_10 = arith.constant 0 : index
    %c0_11 = arith.constant 0 : index
    %24 = vector.load %arg3[%c0_10, %c0_11] : memref<64x1xf32, #tpu.memory_space<vmem>>, vector<64x1xf32>
    %25 = vector.broadcast %24 : vector<64x1xf32> to vector<64x32xf32>
    %26 = arith.addf %23, %25 : vector<64x32xf32>
    %cst_12 = arith.constant 0.000000e+00 : f32
    %27 = vector.broadcast %cst_12 : f32 to vector<64x32xf32>
    %28 = arith.cmpf oge, %26, %27 : vector<64x32xf32>
    %cst_13 = arith.constant 2.000000e-01 : f32
    %29 = vector.broadcast %cst_13 : f32 to vector<64x32xf32>
    %30 = arith.mulf %29, %26 : vector<64x32xf32>
    %31 = arith.select %28, %26, %30 : vector<64x32xi1>, vector<64x32xf32>
    %c0_14 = arith.constant 0 : index
    %c0_15 = arith.constant 0 : index
    %32 = vector.load %arg4[%c0_14, %c0_15] : memref<64x32xf32, #tpu.memory_space<vmem>>, vector<64x32xf32>
    %33 = arith.mulf %32, %31 : vector<64x32xf32>
    %c0_16 = arith.constant 0 : index
    %c0_17 = arith.constant 0 : index
    %34 = vector.load %arg5[%c0_16, %c0_17] : memref<32x2xf32, #tpu.memory_space<vmem>>, vector<32x2xf32>
    %cst_18 = arith.constant dense<0.000000e+00> : vector<64x2xf32>
    %35 = tpu.matmul %33, %34, %cst_18 {dimension_numbers = #tpu.dot_dimension_numbers<[1], [0], [0], [1], [0, 0, 1, 1], [], []>} : vector<64x32xf32>, vector<32x2xf32>, vector<64x2xf32> -> vector<64x2xf32>
    %cst_19 = arith.constant dense<0.000000e+00> : vector<2xf32>
    %36 = vector.multi_reduction <add>, %35, %cst_19 [0] : vector<64x2xf32> to vector<2xf32>
    %37 = vector.shape_cast %36 : vector<2xf32> to vector<1x2xf32>
    %c0_20 = arith.constant 0 : index
    %c0_21 = arith.constant 0 : index
    %38 = vector.load %arg6[%c0_20, %c0_21] : memref<1x1xf32, #tpu.memory_space<vmem>>, vector<1x1xf32>
    %39 = vector.broadcast %38 : vector<1x1xf32> to vector<1x2xf32>
    %40 = arith.addf %37, %39 : vector<1x2xf32>
    %41 = math.absf %40 : vector<1x2xf32>
    %cst_22 = arith.constant 0.000000e+00 : f32
    %42 = vector.broadcast %cst_22 : f32 to vector<1x2xf32>
    %43 = arith.subf %42, %41 : vector<1x2xf32>
    %44 = math.exp %43 : vector<1x2xf32>
    %cst_23 = arith.constant 1.000000e+00 : f32
    %45 = vector.broadcast %cst_23 : f32 to vector<1x2xf32>
    %46 = arith.addf %45, %44 : vector<1x2xf32>
    %47 = tpu.reciprocal %46 {approx = true} : vector<1x2xf32> -> vector<1x2xf32>
    %cst_24 = arith.constant 0.000000e+00 : f32
    %48 = vector.broadcast %cst_24 : f32 to vector<1x2xf32>
    %49 = arith.cmpf oge, %40, %48 : vector<1x2xf32>
    %50 = arith.mulf %44, %47 : vector<1x2xf32>
    %51 = arith.select %49, %47, %50 : vector<1x2xi1>, vector<1x2xf32>
    %c0_25 = arith.constant 0 : index
    %c0_26 = arith.constant 0 : index
    %52 = vector.load %arg7[%c0_25, %c0_26] : memref<1x2xf32, #tpu.memory_space<vmem>>, vector<1x2xf32>
    tpu.vector_store %arg7[%c0_25, %c0_26], %51 {strides = array<i32>} : memref<1x2xf32, #tpu.memory_space<vmem>>, vector<1x2xf32>,
    return
  }
}

</mosaic_0001>

<bundles_post_ra>
// kernel: discriminator_forward.4
= control target key start
LH: loop header
LB: loop body
LE: loop exit
PB: predicated region body
PF: predicated region fallthrough
CT: control target
= control target key end

     0   :  { %s594_s12 = smov 0   ;;  %s596_s13 = smov 0   ;;  %s652_s0 = inlined_call_operand.vmem [shape: bf16[8,48], index: 0, kind: input, shape index: {}]   ;;  %s653_s1 = inlined_call_operand.vmem [shape: bf16[48,2048], index: 1, kind: input, shape index: {}]   ;;  %s654_s2 = inlined_call_operand.vmem [shape: f32[8,1], index: 2, kind: input, shape index: {}]   ;;  %s655_s3 = inlined_call_operand.vmem [shape: bf16[8,2048], index: 3, kind: output, shape index: {}]  }
   0x1   :  { %s598_s14 = smov 0  }
   0x2 LB: > { %s473_s15 = sadd.s32 4294967295, %s571_s14   ;;  %s611_s16 = sadd.s32 1, %s571_s14   ;;  %s571_s14 = sphi %s598_s14, %s658_s14   ;;  %s567_s13 = sphi %s596_s13, %s657_s13   ;;  %s563_s12 = sphi %s594_s12, %s656_s12  }
   0x3   : > { %s38_s17 = ssub.s32 %s571_s14, %s611_s16  ;;  %s41_s18 = sadd.s32 1, %s567_s13 }
   0x4   : > { %p39_p0 = scmp.eq.s32.totalorder %s38_s17, 0  ;;  %p48_p1 = scmp.ne.s32.totalorder %s567_s13, %s563_s12 }
   0x5   : > { %p49_p2 = scmp.eq.s32.totalorder %s571_s14, 0  ;;  %p476_p4 = scmp.ge.s32.totalorder %s571_s14, 4 }
   0x6   : > { %s620_s19 = scalar_select %p39_p0, %s567_s13, %s41_s18  }
   0x7   : > { %p50_p3 = por %p49_p2, %p48_p1  ;;  %127 = sbr.rel (%p476_p4) target bundleno = 24 (0x18), region = 24 }
   0xe   : > { %130 = sbr.rel (!%p50_p3) target bundleno = 24 (0x18), region = 28  ;;  %s132_s20 = sand.u32 (%p50_p3), 1, %s567_s13  }
   0xf   : > { %s500_s21 = sshll.u32 (%p50_p3), %s571_s14, 4  ;;  %s503_s22 = smul.u32 (%p50_p3), 96, %s132_s20 }
  0x10   : > { %s137_s25 = scalar_lea.vmem (%p50_p3), %s653_s1, %s500_s21 }
  0x11   : > { %v150_v0 = vld [vmem:[%s137_s25] sm:$0xff] (%p50_p3)  ;;  %v152_v1 = vld [vmem:[%s137_s25 + $0x8] sm:$0xff] (%p50_p3)  ;;  %s134_s26 = scalar_lea.vmem (%p50_p3), [#allocation2], %s503_s22 }
  0x12   : > { %v154_v2 = vld [vmem:[%s137_s25 + $0x40] sm:$0xff] (%p50_p3)  ;;  %v156_v3 = vld [vmem:[%s137_s25 + $0x48] sm:$0xff] (%p50_p3)  ;;  %151 = vst [vmem:[%s134_s26] sm:$0xff] (%p50_p3), %v150_v0  ;;  %153 = vst [vmem:[%s134_s26 + $0x8] sm:$0xff] (%p50_p3), %v152_v1 }
  0x13   : > { %v158_v4 = vld [vmem:[%s137_s25 + $0x80] sm:$0xff] (%p50_p3)  ;;  %v160_v5 = vld [vmem:[%s137_s25 + $0x88] sm:$0xff] (%p50_p3)  ;;  %155 = vst [vmem:[%s134_s26 + $0x10] sm:$0xff] (%p50_p3), %v154_v2  ;;  %157 = vst [vmem:[%s134_s26 + $0x18] sm:$0xff] (%p50_p3), %v156_v3 }
  0x14   : > { %159 = vst [vmem:[%s134_s26 + $0x20] sm:$0xff] (%p50_p3), %v158_v4  ;;  %161 = vst [vmem:[%s134_s26 + $0x28] sm:$0xff] (%p50_p3), %v160_v5  ;;  %v162_v6 = vld [vmem:[%s137_s25 + $0xc0] sm:$0xff] (%p50_p3)  ;;  %v164_v7 = vld [vmem:[%s137_s25 + $0xc8] sm:$0xff] (%p50_p3) }
  0x15   : > { %v166_v8 = vld [vmem:[%s137_s25 + $0x100] sm:$0xff]  ;;  %163 = vst [vmem:[%s134_s26 + $0x30] sm:$0xff] %v162_v6  ;;  %165 = vst [vmem:[%s134_s26 + $0x38] sm:$0xff] %v164_v7  ;;  %v168_v9 = vld [vmem:[%s137_s25 + $0x108] sm:$0xff] }
  0x16   : > { %167 = vst [vmem:[%s134_s26 + $0x40] sm:$0xff] %v166_v8  ;;  %v170_v10 = vld [vmem:[%s137_s25 + $0x140] sm:$0xff]  ;;  %v172_v11 = vld [vmem:[%s137_s25 + $0x148] sm:$0xff]  ;;  %169 = vst [vmem:[%s134_s26 + $0x48] sm:$0xff] %v168_v9 }
  0x17   : > { %171 = vst [vmem:[%s134_s26 + $0x50] sm:$0xff] %v170_v10  ;;  %173 = vst [vmem:[%s134_s26 + $0x58] sm:$0xff] %v172_v11 }
  0x18 PF: > { %p479_p5 = scmp.ge.s32.totalorder %s571_s14, 1  ;;  %p178_p6 = scmp.lt.s32.totalorder %s571_s14, 5 }
  0x1a   : > { %p179_p7 = pnand %p479_p5, %p178_p6 }
  0x1b   : > { %s185_s27 = sand.u32 (!%p179_p7), 1, %s563_s12   ;;  %v229_v12 = vld [vmem:[%s654_s2] sm:$0xff] (!%p179_p7)  ;;  %v573_v13 = vmov (!%p179_p7), 0   ;;  %vm295_vm0 = vcmask (!%p179_p7), 392192   ;;  %s480_s7 = sshll.u32 (!%p179_p7), %s473_s15, 2 }
  0x1c   : > { %182 = sbr.rel (%p179_p7) target bundleno = 266 (0x10a), region = 51  ;;  %331 = vmatprep.mubr.bf16.mxu0 (!%p179_p7), %v573_v13  ;;  %372 = vmatprep.mubr.bf16.mxu1 (!%p179_p7), %v573_v13  ;;  %v216_v26 = vld [vmem:[%s652_s0] sm:$0xf] (!%p179_p7)  ;;  %p210_p8 = scmp.lt.s32.totalorder (!%p179_p7), %s480_s7, 15 }
  0x1d   : > { %s504_s30 = smul.u32 (!%p179_p7), 96, %s185_s27  ;;  %530 = vset.pattern.permute.xlu0 (!%p179_p7), %v573_v13 }
  0x1e   : > { %232 = vperm.xlu0 (!%p179_p7), %530, %v229_v12  }
  0x1f   : > { %s187_s4 = scalar_lea.vmem (!%p179_p7), [#allocation2], %s504_s30 }
  0x20   : > { %v531_v14 = vld [vmem:[%s187_s4 + $0x4] ss:$16 sps:$4 sm:$0xff] (!%p179_p7)   ;;  %v533_v15 = vld [vmem:[%s187_s4 + $0xc] ss:$16 sps:$4 sm:$0xff] (!%p179_p7)   ;;  %v535_v16 = vld [vmem:[%s187_s4] ss:$16 sps:$4 sm:$0xff] (!%p179_p7)  }
  0x21   : > { %299 = vmatprep.subr.bf16.mxu0 (!%p179_p7), %v531_v14  ;;  %v536_v17 = vld [vmem:[%s187_s4 + $0x8] ss:$16 sps:$4 sm:$0xff] (!%p179_p7)   ;;  %340 = vmatprep.subr.bf16.mxu1 (!%p179_p7), %v533_v15  ;;  %v537_v18 = vld [vmem:[%s187_s4 + $0x24] ss:$16 sps:$4 sm:$0xff] (!%p179_p7)   ;;  %v539_v19 = vld [vmem:[%s187_s4 + $0x2c] ss:$16 sps:$4 sm:$0xff] (!%p179_p7)  }
  0x22   : > { %300 = vmatpush1.bf16.msra.mxu0 (!%p179_p7), %v535_v16  ;;  %341 = vmatpush1.bf16.msra.mxu1 (!%p179_p7), %v536_v17  ;;  %v541_v20 = vld [vmem:[%s187_s4 + $0x20] ss:$16 sps:$4 sm:$0xff] (!%p179_p7)   ;;  %v542_v21 = vld [vmem:[%s187_s4 + $0x28] ss:$16 sps:$4 sm:$0xff] (!%p179_p7)   ;;  %v543_v22 = vld [vmem:[%s187_s4 + $0x44] ss:$16 sps:$4 sm:$0xff] (!%p179_p7)  }
  0x23   : > { %301 = vmatprep.subr.bf16.mxu0 %v537_v18  ;;  %342 = vmatprep.subr.bf16.mxu1 %v539_v19  ;;  %v545_v23 = vld [vmem:[%s187_s4 + $0x4c] ss:$16 sps:$4 sm:$0xff]   ;;  %v547_v24 = vld [vmem:[%s187_s4 + $0x40] ss:$16 sps:$4 sm:$0xff]   ;;  %v548_v25 = vld [vmem:[%s187_s4 + $0x48] ss:$16 sps:$4 sm:$0xff]  }
  0x24   : > { %s660_s7 = smov (!%p210_p8, %s480_s7), 15 }
  0x25   : > { %s481_s8 = sshll.u32 %s660_s7, 2 }
  0x26   : > { %302 = vmatpush1.bf16.msra.mxu0 %v541_v20  ;;  %343 = vmatpush1.bf16.msra.mxu1 %v542_v21  ;;  %s213_s11 = scalar_lea.vmem %s655_s3, %s481_s8 }
  0x27   : > { %303 = vmatprep.subr.bf16.mxu0 %v543_v22  ;;  %344 = vmatprep.subr.bf16.mxu1 %v545_v23 }
  0x2a   : > { %304 = vmatpush1.bf16.msra.mxu0 %v547_v24  ;;  %345 = vmatpush1.bf16.msra.mxu1 %v548_v25 }
  0x2d   : > { %494 = vmatmul.mubr.msk.bf16.vlgmr.msra.gmra.mrb[0].mxu0 %vm295_vm0, %v216_v26  ;;  %495 = vmatmul.mubr.msk.bf16.vlgmr.msra.gmra.mrb[0].mxu1 %vm295_vm0, %v216_v26 }
  0x9d   : > { %v233_v27 = vpop.permute.xlu0 %232 }
 0x100   : > { %v333_v28 = vpop.f32.mrb[0].mxu0  ;;  %v374_v29 = vpop.f32.mrb[0].mxu1 }
 0x101   : > { %v334_v30 = vadd.f32 %v333_v28, %v233_v27  ;;  %v375_v31 = vadd.f32 %v374_v29, %v233_v27  ;;  %v335_v32 = vpop.f32.mrb[1].mxu0  ;;  %v376_v33 = vpop.f32.mrb[1].mxu1 }
 0x102   : > { %v336_v34 = vadd.f32 %v335_v32, %v233_v27  ;;  %v377_v35 = vadd.f32 %v376_v33, %v233_v27  ;;  %v337_v36 = vpop.f32.mrb[2].mxu0  ;;  %v378_v37 = vpop.f32.mrb[2].mxu1 }
 0x103   : > { %vm381_vm1 = vcmp.ge.f32.partialorder %v334_v30, 0.0  ;;  %v385_v38 = vmul.f32 0.2, %v334_v30  ;;  %vm383_vm2 = vcmp.ge.f32.partialorder %v375_v31, 0.0  ;;  %v387_v39 = vmul.f32 0.2, %v375_v31 }
 0x104   : > { %vm382_vm3 = vcmp.ge.f32.partialorder %v336_v34, 0.0  ;;  %v386_v40 = vmul.f32 0.2, %v336_v34  ;;  %vm384_vm4 = vcmp.ge.f32.partialorder %v377_v35, 0.0  ;;  %v388_v41 = vmul.f32 0.2, %v377_v35 }
 0x105   : > { %v389_v42 = vsel %vm381_vm1, %v334_v30, %v385_v38  ;;  %v391_v43 = vsel %vm383_vm2, %v375_v31, %v387_v39  ;;  %v338_v44 = vpop.f32.mrb[3].mxu0  ;;  %v379_v45 = vpop.f32.mrb[3].mxu1 }
 0x106   : > { %v390_v46 = vsel %vm382_vm3, %v336_v34, %v386_v40  ;;  %v392_v47 = vsel %vm384_vm4, %v377_v35, %v388_v41 }
 0x107   : > { %v501_v48 = vpack.c.bf16 %v390_v46, %v389_v42  ;;  %v502_v49 = vpack.c.bf16 %v392_v47, %v391_v43 }
 0x109   : > { %409 = vst [vmem:[%s213_s11] sm:$0xff] %v501_v48  ;;  %410 = vst [vmem:[%s213_s11 + $0x8] sm:$0xff] %v502_v49 }
 0x10a PF: > { %p10_p9 = scmp.ge.s32.totalorder %s611_s16, 6   ;;  %s656_s12 = smov %s567_s13 }
 0x10b   : > { %s657_s13 = smov %s620_s19  ;;  %s658_s14 = smov %s611_s16 }
 0x10c   :  { %12 = sbr.rel (!%p10_p9) target bundleno = 2 (0x2), region = 90 }

// kernel: discriminator_forward.5
= control target key start
LH: loop header
LB: loop body
LE: loop exit
PB: predicated region body
PF: predicated region fallthrough
CT: control target
= control target key end

     0   :  { %v553_v1 = vmov 0   ;;  %s730_s1 = inlined_call_operand.vmem [shape: bf16[128,512], index: 1, kind: input, shape index: {}]   ;;  %s731_s2 = inlined_call_operand.vmem [shape: f32[16,1], index: 2, kind: input, shape index: {}]   ;;  %s732_s0 = inlined_call_operand.vmem [shape: bf16[16,128], index: 0, kind: input, shape index: {}]   ;;  %s733_s3 = inlined_call_operand.vmem [shape: f32[16,1], index: 3, kind: input, shape index: {}]   ;;  %s734_s4 = inlined_call_operand.vmem [shape: bf16[16,512], index: 4, kind: output, shape index: {}]  }
   0x1   :  { %v500_v0 = vld [vmem:[%s730_s1 + $0x4] ss:$16 sps:$4 sm:$0xff]   ;;  %250 = vmatprep.mubr.bf16.mxu0 %v553_v1  ;;  %293 = vmatprep.mubr.bf16.mxu1 %v553_v1  ;;  %v502_v2 = vld [vmem:[%s730_s1 + $0xc] ss:$16 sps:$4 sm:$0xff]   ;;  %v504_v3 = vld [vmem:[%s730_s1] ss:$16 sps:$4 sm:$0xff]  }
   0x2   :  { %499 = vset.pattern.permute.xlu1 %v553_v1  ;;  %498 = vset.pattern.permute.xlu0 %v553_v1  ;;  %v505_v4 = vld [vmem:[%s730_s1 + $0x8] ss:$16 sps:$4 sm:$0xff]   ;;  %v506_v5 = vld [vmem:[%s730_s1 + $0x24] ss:$16 sps:$4 sm:$0xff]   ;;  %v508_v6 = vld [vmem:[%s730_s1 + $0x2c] ss:$16 sps:$4 sm:$0xff]  }
   0x3   :  { %218 = vmatprep.subr.bf16.mxu0 %v500_v0  ;;  %261 = vmatprep.subr.bf16.mxu1 %v502_v2  ;;  %v510_v7 = vld [vmem:[%s730_s1 + $0x20] ss:$16 sps:$4 sm:$0xff]   ;;  %v511_v8 = vld [vmem:[%s730_s1 + $0x28] ss:$16 sps:$4 sm:$0xff]   ;;  %v512_v9 = vld [vmem:[%s730_s1 + $0x44] ss:$16 sps:$4 sm:$0xff]  }
   0x4   :  { %219 = vmatpush1.bf16.msra.mxu0 %v504_v3  ;;  %262 = vmatpush1.bf16.msra.mxu1 %v505_v4  ;;  %v514_v10 = vld [vmem:[%s730_s1 + $0x4c] ss:$16 sps:$4 sm:$0xff]   ;;  %v516_v11 = vld [vmem:[%s730_s1 + $0x40] ss:$16 sps:$4 sm:$0xff]   ;;  %v517_v12 = vld [vmem:[%s730_s1 + $0x48] ss:$16 sps:$4 sm:$0xff]  }
   0x5   :  { %220 = vmatprep.subr.bf16.mxu0 %v506_v5  ;;  %263 = vmatprep.subr.bf16.mxu1 %v508_v6  ;;  %v518_v13 = vld [vmem:[%s730_s1 + $0x64] ss:$16 sps:$4 sm:$0xff]   ;;  %v520_v14 = vld [vmem:[%s730_s1 + $0x6c] ss:$16 sps:$4 sm:$0xff]   ;;  %v522_v15 = vld [vmem:[%s730_s1 + $0x60] ss:$16 sps:$4 sm:$0xff]  }
   0x6   :  { %v523_v16 = vld [vmem:[%s730_s1 + $0x68] ss:$16 sps:$4 sm:$0xff]   ;;  %v524_v17 = vld [vmem:[%s730_s1 + $0x84] ss:$16 sps:$4 sm:$0xff]   ;;  %v526_v18 = vld [vmem:[%s730_s1 + $0x8c] ss:$16 sps:$4 sm:$0xff]  }
   0x7   :  { %v528_v19 = vld [vmem:[%s730_s1 + $0x80] ss:$16 sps:$4 sm:$0xff]   ;;  %v529_v20 = vld [vmem:[%s730_s1 + $0x88] ss:$16 sps:$4 sm:$0xff]   ;;  %v530_v21 = vld [vmem:[%s730_s1 + $0xa4] ss:$16 sps:$4 sm:$0xff]  }
   0x8   :  { %221 = vmatpush1.bf16.msra.mxu0 %v510_v7  ;;  %264 = vmatpush1.bf16.msra.mxu1 %v511_v8  ;;  %v532_v22 = vld [vmem:[%s730_s1 + $0xac] ss:$16 sps:$4 sm:$0xff]   ;;  %v534_v23 = vld [vmem:[%s730_s1 + $0xa0] ss:$16 sps:$4 sm:$0xff]   ;;  %v535_v24 = vld [vmem:[%s730_s1 + $0xa8] ss:$16 sps:$4 sm:$0xff]  }
   0x9   :  { %222 = vmatprep.subr.bf16.mxu0 %v512_v9  ;;  %265 = vmatprep.subr.bf16.mxu1 %v514_v10  ;;  %v536_v25 = vld [vmem:[%s730_s1 + $0xc4] ss:$16 sps:$4 sm:$0xff]   ;;  %v538_v26 = vld [vmem:[%s730_s1 + $0xcc] ss:$16 sps:$4 sm:$0xff]   ;;  %v540_v28 = vld [vmem:[%s730_s1 + $0xc0] ss:$16 sps:$4 sm:$0xff]  }
   0xa   :  { %v361_v27 = vld [vmem:[%s731_s2 + $0x8] sm:$0xff]  ;;  %v380_v30 = vld [vmem:[%s733_s3] sm:$0xff] }
   0xb   :  { %369 = vperm.xlu1 %499, %v361_v27   ;;  %v541_v29 = vld [vmem:[%s730_s1 + $0xc8] ss:$16 sps:$4 sm:$0xff]   ;;  %v542_v31 = vld [vmem:[%s730_s1 + $0xe4] ss:$16 sps:$4 sm:$0xff]   ;;  %v544_v32 = vld [vmem:[%s730_s1 + $0xec] ss:$16 sps:$4 sm:$0xff]  }
   0xc   :  { %223 = vmatpush1.bf16.msra.mxu0 %v516_v11  ;;  %266 = vmatpush1.bf16.msra.mxu1 %v517_v12  ;;  %v546_v33 = vld [vmem:[%s730_s1 + $0xe0] ss:$16 sps:$4 sm:$0xff]   ;;  %v547_v34 = vld [vmem:[%s730_s1 + $0xe8] ss:$16 sps:$4 sm:$0xff]  }
   0xd   :  { %224 = vmatprep.subr.bf16.mxu0 %v518_v13  ;;  %267 = vmatprep.subr.bf16.mxu1 %v520_v14  ;;  %v548_v35 = vld [vmem:[%s732_s0] sm:$0xff]   ;;  %v381_v0 = vld [vmem:[%s733_s3 + $0x8] sm:$0xff] }
   0xe   :  { %v360_v1 = vld [vmem:[%s731_s2] sm:$0xff] }
   0xf   :  { %384 = vperm.xlu1 %499, %v380_v30  }
  0x10   :  { %225 = vmatpush1.bf16.msra.mxu0 %v522_v15  ;;  %268 = vmatpush1.bf16.msra.mxu1 %v523_v16 }
  0x11   :  { %226 = vmatprep.subr.bf16.mxu0 %v524_v17  ;;  %269 = vmatprep.subr.bf16.mxu1 %v526_v18 }
  0x14   :  { %227 = vmatpush1.bf16.msra.mxu0 %v528_v19  ;;  %270 = vmatpush1.bf16.msra.mxu1 %v529_v20 }
  0x15   :  { %228 = vmatprep.subr.bf16.mxu0 %v530_v21  ;;  %271 = vmatprep.subr.bf16.mxu1 %v532_v22 }
  0x18   :  { %229 = vmatpush1.bf16.msra.mxu0 %v534_v23  ;;  %272 = vmatpush1.bf16.msra.mxu1 %v535_v24 }
  0x19   :  { %230 = vmatprep.subr.bf16.mxu0 %v536_v25  ;;  %273 = vmatprep.subr.bf16.mxu1 %v538_v26 }
  0x1c   :  { %231 = vmatpush1.bf16.msra.mxu0 %v540_v28  ;;  %274 = vmatpush1.bf16.msra.mxu1 %v541_v29 }
  0x1d   :  { %232 = vmatprep.subr.bf16.mxu0 %v542_v31  ;;  %275 = vmatprep.subr.bf16.mxu1 %v544_v32 }
  0x20   :  { %233 = vmatpush1.bf16.msra.mxu0 %v546_v33  ;;  %276 = vmatpush1.bf16.msra.mxu1 %v547_v34 }
  0x23   :  { %251 = vmatmul.mubr.bf16.vlgmr.msra.gmra.mrb[0].mxu0 %v548_v35  ;;  %294 = vmatmul.mubr.bf16.vlgmr.msra.gmra.mrb[0].mxu1 %v548_v35 }
  0x8a   :  { %v370_v2 = vpop.permute.xlu1 %369 }
  0x8e   :  { %v385_v3 = vpop.permute.xlu1 %384 }
  0xf6   :  { %v252_v36 = vpop.f32.mrb[0].mxu0  ;;  %v295_v37 = vpop.f32.mrb[0].mxu1 }
  0xf7   :  { %v314_v38 = vmul.f32 %v252_v36, %v252_v36  ;;  %v254_v39 = vpop.f32.mrb[1].mxu0  ;;  %v297_v40 = vpop.f32.mrb[1].mxu1  ;;  %v316_v45 = vmul.f32 %v295_v37, %v295_v37 }
  0xf8   :  { %v304_v41 = vadd.f32 %v254_v39, %v252_v36  ;;  %v315_v42 = vmul.f32 %v254_v39, %v254_v39  ;;  %v684_v43 = vpop.f32.mrb[2].mxu0  ;;  %v686_v44 = vpop.f32.mrb[2].mxu1  ;;  %v317_v57 = vmul.f32 %v297_v40, %v297_v40 }
  0xf9   :  { %v318_v46 = vmul.f32 %v684_v43, %v684_v43  ;;  %v690_v47 = vpop.f32.mrb[3].mxu0  ;;  %v692_v48 = vpop.f32.mrb[3].mxu1  ;;  %v320_v53 = vmul.f32 %v686_v44, %v686_v44 }
  0xfa   :  { %v309_v49 = vadd.f32 %v690_v47, %v684_v43  ;;  %v319_v50 = vmul.f32 %v690_v47, %v690_v47  ;;  %v305_v51 = vadd.f32 %v304_v41, %v295_v37  ;;  %v322_v52 = vadd.f32 %v315_v42, %v314_v38 }
  0xfb   :  { %v321_v59 = vmul.f32 %v692_v48, %v692_v48 }
  0xfc   :  { %v327_v54 = vadd.f32 %v319_v50, %v318_v46  ;;  %v306_v55 = vadd.f32 %v305_v51, %v297_v40  ;;  %v310_v56 = vadd.f32 %v309_v49, %v686_v44  ;;  %v323_v58 = vadd.f32 %v322_v52, %v316_v45 }
  0xfe   :  { %307 = vadd.xlane.f32.xlu0 %v306_v55  ;;  %v311_v60 = vadd.f32 %v310_v56, %v692_v48  ;;  %v328_v61 = vadd.f32 %v327_v54, %v320_v53  ;;  %v324_v62 = vadd.f32 %v323_v58, %v317_v57 }
 0x100   :  { %v329_v63 = vadd.f32 %v328_v61, %v321_v59  ;;  %325 = vadd.xlane.f32.xlu1 %v324_v62 }
 0x102   :  { %312 = vadd.xlane.f32.xlu0 %v311_v60 }
 0x104   :  { %330 = vadd.xlane.f32.xlu1 %v329_v63 }
 0x115   :  { %389 = vperm.xlu1 %499, %v381_v0  }
 0x118   :  { %364 = vperm.xlu0 %498, %v360_v1  }
 0x18b   :  { %v308_v4 = vpop.xlane.xlu0 %307 }
 0x18c   :  { %v332_v5 = vmul.f32 0.001953125, %v308_v4 }
 0x18d   :  { %v326_v6 = vpop.xlane.xlu1 %325 }
 0x18e   :  { %v336_v7 = vmul.f32 %v332_v5, %v332_v5  ;;  %v334_v8 = vmul.f32 0.001953125, %v326_v6  ;;  %v340_v18 = vsub.f32 %v252_v36, %v332_v5  ;;  %v341_v19 = vsub.f32 %v254_v39, %v332_v5 }
 0x18f   :  { %v313_v9 = vpop.xlane.xlu0 %312  ;;  %v342_v20 = vsub.f32 %v295_v37, %v332_v5  ;;  %v343_v21 = vsub.f32 %v297_v40, %v332_v5 }
 0x190   :  { %v333_v10 = vmul.f32 0.001953125, %v313_v9  ;;  %v338_v11 = vsub.f32 %v334_v8, %v336_v7 }
 0x191   :  { %v331_v12 = vpop.xlane.xlu1 %330 }
 0x192   :  { %v337_v13 = vmul.f32 %v333_v10, %v333_v10  ;;  %v348_v14 = vadd.f32 1e-05, %v338_v11  ;;  %v335_v15 = vmul.f32 0.001953125, %v331_v12  ;;  %v344_v28 = vsub.f32 %v684_v43, %v333_v10 }
 0x193   :  { %v345_v29 = vsub.f32 %v690_v47, %v333_v10  ;;  %v346_v30 = vsub.f32 %v686_v44, %v333_v10  ;;  %v347_v31 = vsub.f32 %v692_v48, %v333_v10 }
 0x194   :  { %549 = vrsqrt.f32 %v348_v14  ;;  %v339_v16 = vsub.f32 %v335_v15, %v337_v13 }
 0x195   :  { %v390_v44 = vpop.permute.xlu1 %389 }
 0x196   :  { %v349_v17 = vadd.f32 1e-05, %v339_v16 }
 0x197   :  { %v365_v23 = vpop.permute.xlu0 %364 }
 0x198   :  { %551 = vrsqrt.f32 %v349_v17 }
 0x19e   :  { %v550_v22 = vpop.eup %549 }
 0x19f   :  { %v352_v24 = vmul.f32 %v550_v22, %v340_v18  ;;  %v353_v25 = vmul.f32 %v550_v22, %v341_v19  ;;  %v354_v26 = vmul.f32 %v550_v22, %v342_v20  ;;  %v355_v27 = vmul.f32 %v550_v22, %v343_v21 }
 0x1a1   :  { %v372_v32 = vmul.f32 %v365_v23, %v352_v24  ;;  %v373_v33 = vmul.f32 %v365_v23, %v353_v25  ;;  %v374_v34 = vmul.f32 %v365_v23, %v354_v26  ;;  %v375_v35 = vmul.f32 %v365_v23, %v355_v27 }
 0x1a2   :  { %v552_v36 = vpop.eup %551 }
 0x1a3   :  { %v356_v37 = vmul.f32 %v552_v36, %v344_v28  ;;  %v357_v38 = vmul.f32 %v552_v36, %v345_v29  ;;  %v358_v39 = vmul.f32 %v552_v36, %v346_v30  ;;  %v359_v40 = vmul.f32 %v552_v36, %v347_v31 }
 0x1a4   :  { %v392_v41 = vadd.f32 %v385_v3, %v372_v32  ;;  %v393_v42 = vadd.f32 %v385_v3, %v373_v33  ;;  %v394_v45 = vadd.f32 %v385_v3, %v374_v34  ;;  %v395_v46 = vadd.f32 %v385_v3, %v375_v35 }
 0x1a5   :  { %v376_v43 = vmul.f32 %v370_v2, %v356_v37  ;;  %v377_v49 = vmul.f32 %v370_v2, %v357_v38  ;;  %v378_v47 = vmul.f32 %v370_v2, %v358_v39  ;;  %v379_v50 = vmul.f32 %v370_v2, %v359_v40 }
 0x1a6   :  { %vm400_vm0 = vcmp.ge.f32.partialorder %v392_v41, 0.0  ;;  %vm401_vm1 = vcmp.ge.f32.partialorder %v393_v42, 0.0  ;;  %vm402_vm2 = vcmp.ge.f32.partialorder %v394_v45, 0.0  ;;  %vm403_vm3 = vcmp.ge.f32.partialorder %v395_v46, 0.0 }
 0x1a7   :  { %v396_v48 = vadd.f32 %v390_v44, %v376_v43  ;;  %v397_v51 = vadd.f32 %v390_v44, %v377_v49  ;;  %v398_v52 = vadd.f32 %v390_v44, %v378_v47  ;;  %v399_v53 = vadd.f32 %v390_v44, %v379_v50 }
 0x1a8   :  { %v408_v54 = vmul.f32 0.2, %v392_v41  ;;  %v409_v55 = vmul.f32 0.2, %v393_v42  ;;  %v410_v56 = vmul.f32 0.2, %v394_v45 }
 0x1a9   :  { %vm404_vm4 = vcmp.ge.f32.partialorder %v396_v48, 0.0  ;;  %vm405_vm5 = vcmp.ge.f32.partialorder %v397_v51, 0.0  ;;  %vm406_vm6 = vcmp.ge.f32.partialorder %v398_v52, 0.0  ;;  %vm407_vm7 = vcmp.ge.f32.partialorder %v399_v53, 0.0 }
 0x1aa   :  { %v412_v57 = vmul.f32 0.2, %v396_v48  ;;  %v413_v58 = vmul.f32 0.2, %v397_v51  ;;  %v414_v59 = vmul.f32 0.2, %v398_v52  ;;  %v416_v60 = vsel %vm400_vm0, %v392_v41, %v408_v54 }
 0x1ab   :  { %v415_v61 = vmul.f32 0.2, %v399_v53  ;;  %v411_v62 = vmul.f32 0.2, %v395_v46  ;;  %v417_v63 = vsel %vm401_vm1, %v393_v42, %v409_v55  ;;  %v418_v0 = vsel %vm402_vm2, %v394_v45, %v410_v56 }
 0x1ac   :  { %v420_v1 = vsel %vm404_vm4, %v396_v48, %v412_v57  ;;  %v421_v2 = vsel %vm405_vm5, %v397_v51, %v413_v58  ;;  %v422_v3 = vsel %vm406_vm6, %v398_v52, %v414_v59  ;;  %v493_v4 = vpack.c.bf16 %v417_v63, %v416_v60 }
 0x1ad   :  { %v423_v5 = vsel %vm407_vm7, %v399_v53, %v415_v61  ;;  %v495_v6 = vpack.c.bf16 %v421_v2, %v420_v1  ;;  %v419_v7 = vsel %vm403_vm3, %v395_v46, %v411_v62 }
 0x1ae   :  { %v496_v8 = vpack.c.bf16 %v423_v5, %v422_v3  ;;  %v494_v9 = vpack.c.bf16 %v419_v7, %v418_v0  ;;  %448 = vst [vmem:[%s734_s4] sm:$0xff] %v493_v4 }
 0x1af   :  { %450 = vst [vmem:[%s734_s4 + $0x10] sm:$0xff] %v495_v6 }
 0x1b0   :  { %451 = vst [vmem:[%s734_s4 + $0x18] sm:$0xff] %v496_v8  ;;  %449 = vst [vmem:[%s734_s4 + $0x8] sm:$0xff] %v494_v9 }

// kernel: discriminator_forward.6
= control target key start
LH: loop header
LB: loop body
LE: loop exit
PB: predicated region body
PF: predicated region fallthrough
CT: control target
= control target key end

     0   :  { %v479_v20 = vmov 0   ;;  %s619_s1 = inlined_call_operand.vmem [shape: bf16[256,128], index: 1, kind: input, shape index: {}]   ;;  %s620_s0 = inlined_call_operand.vmem [shape: bf16[32,256], index: 0, kind: input, shape index: {}]   ;;  %s621_s2 = inlined_call_operand.vmem [shape: f32[32,1], index: 2, kind: input, shape index: {}]   ;;  %s622_s3 = inlined_call_operand.vmem [shape: f32[32,1], index: 3, kind: input, shape index: {}]   ;;  %s623_s4 = inlined_call_operand.vmem [shape: bf16[32,128], index: 4, kind: output, shape index: {}]  }
   0x1   :  { %v449_v0 = vld [vmem:[%s619_s1 + $0x40] sm:$0xff]   ;;  %v451_v2 = vld [vmem:[%s619_s1 + $0x48] sm:$0xff]   ;;  %v453_v4 = vld [vmem:[%s619_s1 + $0x50] sm:$0xff]   ;;  %448 = vset.pattern.permute.xlu1 %v479_v20  ;;  %447 = vset.pattern.permute.xlu0 %v479_v20 }
   0x2   :  { %v450_v1 = vld [vmem:[%s619_s1] sm:$0xff]   ;;  %402 = vmatprep.subr.bf16.mxu0 %v449_v0  ;;  %430 = vmatprep.subr.bf16.mxu1 %v449_v0  ;;  %v452_v3 = vld [vmem:[%s619_s1 + $0x8] sm:$0xff]   ;;  %v454_v5 = vld [vmem:[%s619_s1 + $0x10] sm:$0xff]  }
   0x3   :  { %403 = vmatpush3.bf16.msra.mxu0 %v450_v1  ;;  %438 = vmatpush3.bf16.msra.mxu1 %v450_v1  ;;  %v455_v6 = vld [vmem:[%s619_s1 + $0x58] sm:$0xff]   ;;  %v457_v8 = vld [vmem:[%s619_s1 + $0x60] sm:$0xff]   ;;  %v459_v10 = vld [vmem:[%s619_s1 + $0x68] sm:$0xff]  }
   0x4   :  { %404 = vmatprep.subr.bf16.mxu0 %v451_v2  ;;  %431 = vmatprep.subr.bf16.mxu1 %v451_v2  ;;  %v456_v7 = vld [vmem:[%s619_s1 + $0x18] sm:$0xff]   ;;  %v458_v9 = vld [vmem:[%s619_s1 + $0x20] sm:$0xff]   ;;  %v460_v13 = vld [vmem:[%s619_s1 + $0x28] sm:$0xff]  }
   0x5   :  { %v467_v11 = vld [vmem:[%s620_s0 + $0x4] ss:$8 sps:$4 sm:$0xff]   ;;  %v470_v12 = vld [vmem:[%s620_s0 + $0x14] ss:$8 sps:$4 sm:$0xff]   ;;  %v465_v18 = vld [vmem:[%s620_s0] ss:$8 sps:$4 sm:$0xff]  }
   0x6   :  { %v461_v14 = vld [vmem:[%s619_s1 + $0x70] sm:$0xff]   ;;  %202 = vmatprep.mubr.bf16.mxu0 %v467_v11  ;;  %210 = vmatprep.mubr.bf16.mxu1 %v470_v12  ;;  %v463_v16 = vld [vmem:[%s619_s1 + $0x78] sm:$0xff]   ;;  %v272_v35 = vld [vmem:[%s621_s2 + $0x8] sm:$0xff] }
   0x7   :  { %405 = vmatpush3.bf16.msra.mxu0 %v452_v3  ;;  %439 = vmatpush3.bf16.msra.mxu1 %v452_v3  ;;  %v462_v15 = vld [vmem:[%s619_s1 + $0x30] sm:$0xff]   ;;  %v464_v17 = vld [vmem:[%s619_s1 + $0x38] sm:$0xff]   ;;  %v299_v38 = vld [vmem:[%s622_s3] sm:$0xff] }
   0x8   :  { %406 = vmatprep.subr.bf16.mxu0 %v453_v4  ;;  %432 = vmatprep.subr.bf16.mxu1 %v453_v4  ;;  %v468_v19 = vld [vmem:[%s620_s0 + $0x10] ss:$8 sps:$4 sm:$0xff]   ;;  %v271_v39 = vld [vmem:[%s621_s2] sm:$0xff]  ;;  %v300_v40 = vld [vmem:[%s622_s3 + $0x8] sm:$0xff] }
   0x9   :  { %v273_v36 = vld [vmem:[%s621_s2 + $0x10] sm:$0xff]  ;;  %v274_v37 = vld [vmem:[%s621_s2 + $0x18] sm:$0xff] }
   0xa   :  { %v301_v41 = vld [vmem:[%s622_s3 + $0x10] sm:$0xff]  ;;  %v302_v44 = vld [vmem:[%s622_s3 + $0x18] sm:$0xff] }
   0xb   :  { %407 = vmatpush3.bf16.msra.mxu0 %v454_v5  ;;  %440 = vmatpush3.bf16.msra.mxu1 %v454_v5 }
   0xc   :  { %408 = vmatprep.subr.bf16.mxu0 %v455_v6  ;;  %433 = vmatprep.subr.bf16.mxu1 %v455_v6 }
   0xf   :  { %409 = vmatpush3.bf16.msra.mxu0 %v456_v7  ;;  %441 = vmatpush3.bf16.msra.mxu1 %v456_v7 }
  0x10   :  { %410 = vmatprep.subr.bf16.mxu0 %v457_v8  ;;  %434 = vmatprep.subr.bf16.mxu1 %v457_v8 }
  0x13   :  { %411 = vmatpush3.bf16.msra.mxu0 %v458_v9  ;;  %442 = vmatpush3.bf16.msra.mxu1 %v458_v9 }
  0x14   :  { %412 = vmatprep.subr.bf16.mxu0 %v459_v10  ;;  %435 = vmatprep.subr.bf16.mxu1 %v459_v10 }
  0x17   :  { %413 = vmatpush3.bf16.msra.mxu0 %v460_v13  ;;  %443 = vmatpush3.bf16.msra.mxu1 %v460_v13 }
  0x18   :  { %414 = vmatprep.subr.bf16.mxu0 %v461_v14  ;;  %436 = vmatprep.subr.bf16.mxu1 %v461_v14 }
  0x1b   :  { %415 = vmatpush3.bf16.msra.mxu0 %v462_v15  ;;  %444 = vmatpush3.bf16.msra.mxu1 %v462_v15 }
  0x1c   :  { %416 = vmatprep.subr.bf16.mxu0 %v463_v16  ;;  %437 = vmatprep.subr.bf16.mxu1 %v463_v16 }
  0x1f   :  { %417 = vmatpush3.bf16.msra.mxu0 %v464_v17  ;;  %445 = vmatpush3.bf16.msra.mxu1 %v464_v17 }
  0x22   :  { %203 = vmatmul.mubr.bf16.vlgmr.msra.gmra.mrb[0].mxu0 %v465_v18  ;;  %211 = vmatmul.mubr.bf16.vlgmr.msra.gmra.mrb[0].mxu1 %v468_v19 }
  0xf5   :  { %v418_v21 = vpop.f32.mrb[0].mxu0  ;;  %v424_v22 = vpop.f32.mrb[0].mxu1 }
  0xf6   :  { %v419_v23 = vpop.f32.mrb[1].mxu0  ;;  %v425_v24 = vpop.f32.mrb[1].mxu1 }
  0xf7   :  { %v565_v25 = vadd.f32 %v419_v23, %v418_v21  ;;  %v567_v26 = vadd.f32 %v425_v24, %v424_v22  ;;  %v427_v27 = vpop.f32.mrb[2].mxu1  ;;  %v421_v28 = vpop.f32.mrb[2].mxu0 }
  0xf8   :  { %v428_v29 = vpop.f32.mrb[3].mxu1  ;;  %v422_v30 = vpop.f32.mrb[3].mxu0 }
  0xf9   :  { %v569_v31 = vadd.f32 %v428_v29, %v427_v27  ;;  %223 = vadd.xlane.f32.xlu1 %v567_v26  ;;  %219 = vadd.xlane.f32.xlu0 %v565_v25  ;;  %v573_v32 = vadd.f32 %v422_v30, %v421_v28  ;;  %v227_v33 = vmul.f32 %v565_v25, %v565_v25 }
  0xfa   :  { %v229_v34 = vmul.f32 %v567_v26, %v567_v26 }
  0xfb   :  { %v228_v42 = vmul.f32 %v573_v32, %v573_v32  ;;  %v230_v43 = vmul.f32 %v569_v31, %v569_v31 }
  0xfd   :  { %225 = vadd.xlane.f32.xlu1 %v569_v31  ;;  %221 = vadd.xlane.f32.xlu0 %v573_v32 }
 0x101   :  { %231 = vadd.xlane.f32.xlu0 %v227_v33 }
 0x105   :  { %235 = vadd.xlane.f32.xlu0 %v229_v34 }
 0x10e   :  { %282 = vperm.xlu1 %448, %v272_v35  }
 0x112   :  { %287 = vperm.xlu1 %448, %v273_v36  }
 0x116   :  { %292 = vperm.xlu1 %448, %v274_v37  }
 0x11a   :  { %305 = vperm.xlu1 %448, %v299_v38  }
 0x11b   :  { %277 = vperm.xlu0 %447, %v271_v39  }
 0x11e   :  { %310 = vperm.xlu1 %448, %v300_v40  }
 0x122   :  { %315 = vperm.xlu1 %448, %v301_v41  }
 0x146   :  { %233 = vadd.xlane.f32.xlu1 %v228_v42 }
 0x14a   :  { %237 = vadd.xlane.f32.xlu1 %v230_v43 }
 0x15b   :  { %320 = vperm.xlu1 %448, %v302_v44  }
 0x186   :  { %v224_v45 = vpop.xlane.xlu1 %223  ;;  %v220_v48 = vpop.xlane.xlu0 %219 }
 0x187   :  { %v239_v53 = vmul.f32 0.0078125, %v220_v48  ;;  %v241_v58 = vmul.f32 0.0078125, %v224_v45 }
 0x189   :  { %v247_v55 = vmul.f32 %v239_v53, %v239_v53  ;;  %v249_v62 = vmul.f32 %v241_v58, %v241_v58  ;;  %v255_v15 = vsub.f32 %v565_v25, %v239_v53  ;;  %v257_v20 = vsub.f32 %v567_v26, %v241_v58 }
 0x18a   :  { %v226_v46 = vpop.xlane.xlu1 %225  ;;  %v222_v50 = vpop.xlane.xlu0 %221 }
 0x18b   :  { %v240_v3 = vmul.f32 0.0078125, %v222_v50  ;;  %v242_v5 = vmul.f32 0.0078125, %v226_v46 }
 0x18d   :  { %v248_v6 = vmul.f32 %v240_v3, %v240_v3  ;;  %v250_v10 = vmul.f32 %v242_v5, %v242_v5  ;;  %v256_v23 = vsub.f32 %v573_v32, %v240_v3  ;;  %v258_v30 = vsub.f32 %v569_v31, %v242_v5 }
 0x18e   :  { %v283_v47 = vpop.permute.xlu1 %282  ;;  %v232_v52 = vpop.xlane.xlu0 %231 }
 0x18f   :  { %v243_v56 = vmul.f32 0.0078125, %v232_v52 }
 0x191   :  { %v251_v59 = vsub.f32 %v243_v56, %v247_v55 }
 0x192   :  { %v288_v49 = vpop.permute.xlu1 %287  ;;  %v236_v57 = vpop.xlane.xlu0 %235 }
 0x193   :  { %v245_v60 = vmul.f32 0.0078125, %v236_v57  ;;  %v259_v63 = vadd.f32 1e-05, %v251_v59 }
 0x195   :  { %v253_v0 = vsub.f32 %v245_v60, %v249_v62  ;;  %471 = vrsqrt.f32 %v259_v63 }
 0x196   :  { %v293_v51 = vpop.permute.xlu1 %292 }
 0x197   :  { %v261_v2 = vadd.f32 1e-05, %v253_v0 }
 0x199   :  { %473 = vrsqrt.f32 %v261_v2 }
 0x19a   :  { %v306_v54 = vpop.permute.xlu1 %305  ;;  %v278_v19 = vpop.permute.xlu0 %277 }
 0x19e   :  { %v311_v61 = vpop.permute.xlu1 %310 }
 0x19f   :  { %v472_v13 = vpop.eup %471 }
 0x1a0   :  { %v267_v17 = vmul.f32 %v472_v13, %v255_v15 }
 0x1a2   :  { %v316_v1 = vpop.permute.xlu1 %315  ;;  %v295_v21 = vmul.f32 %v278_v19, %v267_v17 }
 0x1a3   :  { %v474_v18 = vpop.eup %473 }
 0x1a4   :  { %v269_v22 = vmul.f32 %v474_v18, %v257_v20  ;;  %v323_v27 = vadd.f32 %v306_v54, %v295_v21 }
 0x1a6   :  { %v297_v28 = vmul.f32 %v288_v49, %v269_v22  ;;  %v331_v25 = vmul.f32 0.2, %v323_v27  ;;  %vm327_vm0 = vcmp.ge.f32.partialorder %v323_v27, 0.0 }
 0x1a8   :  { %v325_v35 = vadd.f32 %v316_v1, %v297_v28  ;;  %v335_v40 = vsel %vm327_vm0, %v323_v27, %v331_v25 }
 0x1aa   :  { %v333_v41 = vmul.f32 0.2, %v325_v35  ;;  %vm329_vm2 = vcmp.ge.f32.partialorder %v325_v35, 0.0 }
 0x1ac   :  { %v337_v31 = vsel %vm329_vm2, %v325_v35, %v333_v41 }
 0x1d3   :  { %v234_v4 = vpop.xlane.xlu1 %233 }
 0x1d4   :  { %v244_v7 = vmul.f32 0.0078125, %v234_v4 }
 0x1d6   :  { %v252_v8 = vsub.f32 %v244_v7, %v248_v6 }
 0x1d7   :  { %v238_v9 = vpop.xlane.xlu1 %237 }
 0x1d8   :  { %v260_v11 = vadd.f32 1e-05, %v252_v8  ;;  %v246_v12 = vmul.f32 0.0078125, %v238_v9 }
 0x1da   :  { %475 = vrsqrt.f32 %v260_v11  ;;  %v254_v14 = vsub.f32 %v246_v12, %v250_v10 }
 0x1db   :  { %v321_v39 = vpop.permute.xlu1 %320 }
 0x1dc   :  { %v262_v16 = vadd.f32 1e-05, %v254_v14 }
 0x1de   :  { %477 = vrsqrt.f32 %v262_v16 }
 0x1e4   :  { %v476_v24 = vpop.eup %475 }
 0x1e5   :  { %v268_v29 = vmul.f32 %v476_v24, %v256_v23 }
 0x1e7   :  { %v296_v33 = vmul.f32 %v283_v47, %v268_v29 }
 0x1e8   :  { %v478_v34 = vpop.eup %477 }
 0x1e9   :  { %v270_v36 = vmul.f32 %v478_v34, %v258_v30  ;;  %v324_v37 = vadd.f32 %v311_v61, %v296_v33 }
 0x1eb   :  { %v298_v38 = vmul.f32 %v293_v51, %v270_v36  ;;  %vm328_vm1 = vcmp.ge.f32.partialorder %v324_v37, 0.0  ;;  %v332_v26 = vmul.f32 0.2, %v324_v37 }
 0x1ed   :  { %v326_v32 = vadd.f32 %v321_v39, %v298_v38  ;;  %v336_v42 = vsel %vm328_vm1, %v324_v37, %v332_v26 }
 0x1ee   :  { %v394_v43 = vpack.c.bf16 %v336_v42, %v335_v40 }
 0x1ef   :  { %vm330_vm3 = vcmp.ge.f32.partialorder %v326_v32, 0.0  ;;  %v334_v44 = vmul.f32 0.2, %v326_v32 }
 0x1f0   :  { %395 = vst [vmem:[%s623_s4] sm:$0xff] %v394_v43  }
 0x1f1   :  { %v338_v45 = vsel %vm330_vm3, %v326_v32, %v334_v44 }
 0x1f2   :  { %v399_v46 = vpack.c.bf16 %v338_v45, %v337_v31 }
 0x1f4   :  { %401 = vst [vmem:[%s623_s4 + $0x8] sm:$0xff] %v399_v46  }

// kernel: discriminator_forward.7
= control target key start
LH: loop header
LB: loop body
LE: loop exit
PB: predicated region body
PF: predicated region fallthrough
CT: control target
= control target key end

     0   :  { %s1689_s0 = inlined_call_operand.vmem [shape: bf16[64,512], index: 0, kind: input, shape index: {}]   ;;  %s1690_s1 = inlined_call_operand.vmem [shape: bf16[512,32], index: 1, kind: input, shape index: {}]   ;;  %s1691_s2 = inlined_call_operand.vmem [shape: f32[64,1], index: 2, kind: input, shape index: {}]   ;;  %s1692_s3 = inlined_call_operand.vmem [shape: f32[64,1], index: 3, kind: input, shape index: {}]   ;;  %s1693_s4 = inlined_call_operand.vmem [shape: f32[64,32], index: 4, kind: input, shape index: {}]   ;;  %s1694_s5 = inlined_call_operand.vmem [shape: f32[32,2], index: 5, kind: input, shape index: {}]   ;;  %s1695_s6 = inlined_call_operand.<no memory space> [shape: f32[1,1], index: 6, kind: input, shape index: {}]   ;;  %s1696_s7 = inlined_call_operand.hbm [shape: f32[1,2], index: 7, kind: output, shape index: {}]  }
   0x1   :  { %v12_v0 = vstv %s1695_s6 }
   0x2   :  { %13 = vst [vmem:[#allocation2] sm:$0x1] %v12_v0 }
   0x3   :  { %v1160_v1 = vld [vmem:[%s1690_s1 + $0x40] sm:$0xff]   ;;  %v1260_v3 = vmov 0   ;;  %v1164_v6 = vld [vmem:[%s1690_s1 + $0x48] sm:$0xff]   ;;  %v1168_v10 = vld [vmem:[%s1690_s1 + $0x50] sm:$0xff]  }
   0x4   :  { %v1161_v2 = vld [vmem:[%s1690_s1 + $0xc0] sm:$0xff]   ;;  %1159 = vset.pattern.permute.xlu1 %v1260_v3  ;;  %1158 = vset.pattern.permute.xlu0 %v1260_v3  ;;  %v1165_v7 = vld [vmem:[%s1690_s1 + $0xc8] sm:$0xff]   ;;  %v1169_v11 = vld [vmem:[%s1690_s1 + $0xd0] sm:$0xff]  }
   0x5   :  { %1032 = vmatprep.subr.bf16.mxu0 %v1160_v1  ;;  %v1162_v4 = vld [vmem:[%s1690_s1] sm:$0xff]   ;;  %1072 = vmatprep.subr.bf16.mxu1 %v1161_v2  ;;  %v1166_v8 = vld [vmem:[%s1690_s1 + $0x8] sm:$0xff]   ;;  %v1170_v12 = vld [vmem:[%s1690_s1 + $0x10] sm:$0xff]  }
   0x6   :  { %v1163_v5 = vld [vmem:[%s1690_s1 + $0x80] sm:$0xff]   ;;  %1033 = vmatpush3.bf16.msra.mxu0 %v1162_v4  ;;  %v1167_v9 = vld [vmem:[%s1690_s1 + $0x88] sm:$0xff]   ;;  %v1171_v13 = vld [vmem:[%s1690_s1 + $0x90] sm:$0xff]  }
   0x7   :  { %1073 = vmatpush3.bf16.msra.mxu1 %v1163_v5  ;;  %1034 = vmatprep.subr.bf16.mxu0 %v1164_v6  ;;  %v1172_v14 = vld [vmem:[%s1690_s1 + $0x58] sm:$0xff]   ;;  %v1176_v18 = vld [vmem:[%s1690_s1 + $0x60] sm:$0xff]   ;;  %v1180_v22 = vld [vmem:[%s1690_s1 + $0x68] sm:$0xff]  }
   0x8   :  { %1074 = vmatprep.subr.bf16.mxu1 %v1165_v7  ;;  %v1173_v15 = vld [vmem:[%s1690_s1 + $0xd8] sm:$0xff]   ;;  %v1177_v19 = vld [vmem:[%s1690_s1 + $0xe0] sm:$0xff]   ;;  %v1181_v23 = vld [vmem:[%s1690_s1 + $0xe8] sm:$0xff]  }
   0x9   :  { %v1174_v16 = vld [vmem:[%s1690_s1 + $0x18] sm:$0xff]   ;;  %v1178_v20 = vld [vmem:[%s1690_s1 + $0x20] sm:$0xff]   ;;  %v1182_v24 = vld [vmem:[%s1690_s1 + $0x28] sm:$0xff]  }
   0xa   :  { %1035 = vmatpush3.bf16.msra.mxu0 %v1166_v8  ;;  %v1175_v17 = vld [vmem:[%s1690_s1 + $0x98] sm:$0xff]   ;;  %v1179_v21 = vld [vmem:[%s1690_s1 + $0xa0] sm:$0xff]   ;;  %v1183_v25 = vld [vmem:[%s1690_s1 + $0xa8] sm:$0xff]  }
   0xb   :  { %1075 = vmatpush3.bf16.msra.mxu1 %v1167_v9  ;;  %1036 = vmatprep.subr.bf16.mxu0 %v1168_v10  ;;  %v1184_v26 = vld [vmem:[%s1690_s1 + $0x70] sm:$0xff]   ;;  %v1188_v30 = vld [vmem:[%s1690_s1 + $0x78] sm:$0xff]   ;;  %v634_v44 = vld [vmem:[%s1691_s2 + $0x8] sm:$0xff] }
   0xc   :  { %1076 = vmatprep.subr.bf16.mxu1 %v1169_v11  ;;  %v1185_v27 = vld [vmem:[%s1690_s1 + $0xf0] sm:$0xff]   ;;  %v1189_v31 = vld [vmem:[%s1690_s1 + $0xf8] sm:$0xff]   ;;  %648 = vperm.xlu1 %1159, %v634_v44   ;;  %v689_v45 = vld [vmem:[%s1692_s3] sm:$0xff] }
   0xd   :  { %v1186_v28 = vld [vmem:[%s1690_s1 + $0x30] sm:$0xff]   ;;  %v1190_v32 = vld [vmem:[%s1690_s1 + $0x38] sm:$0xff]   ;;  %v633_v46 = vld [vmem:[%s1691_s2] sm:$0xff] }
   0xe   :  { %1037 = vmatpush3.bf16.msra.mxu0 %v1170_v12  ;;  %v1187_v29 = vld [vmem:[%s1690_s1 + $0xb0] sm:$0xff]   ;;  %v1191_v33 = vld [vmem:[%s1690_s1 + $0xb8] sm:$0xff]   ;;  %643 = vperm.xlu0 %1158, %v633_v46  }
   0xf   :  { %1077 = vmatpush3.bf16.msra.mxu1 %v1171_v13  ;;  %1038 = vmatprep.subr.bf16.mxu0 %v1172_v14  ;;  %v1192_v34 = vld [vmem:[%s1689_s0] ss:$16 sps:$4 sm:$0xff]   ;;  %v1194_v35 = vld [vmem:[%s1689_s0 + $0x4] ss:$16 sps:$4 sm:$0xff]   ;;  %v1195_v36 = vld [vmem:[%s1689_s0 + $0x8] ss:$16 sps:$4 sm:$0xff]  }
  0x10   :  { %1078 = vmatprep.subr.bf16.mxu1 %v1173_v15  ;;  %v1197_v37 = vld [vmem:[%s1689_s0 + $0xc] ss:$16 sps:$4 sm:$0xff]   ;;  %414 = vmatprep.mubr.bf16.mxu0 %v1194_v35  ;;  %v1198_v38 = vld [vmem:[%s1689_s0 + $0x24] ss:$16 sps:$4 sm:$0xff]   ;;  %v1202_v40 = vld [vmem:[%s1689_s0 + $0x20] ss:$16 sps:$4 sm:$0xff]  }
  0x11   :  { %479 = vmatprep.mubr.bf16.mxu1 %v1197_v37  ;;  %v1200_v39 = vld [vmem:[%s1689_s0 + $0x2c] ss:$16 sps:$4 sm:$0xff]   ;;  %v1203_v41 = vld [vmem:[%s1689_s0 + $0x28] ss:$16 sps:$4 sm:$0xff]   ;;  %v1204_v42 = vld [vmem:[%s1689_s0 + $0x44] ss:$16 sps:$4 sm:$0xff]   ;;  %699 = vperm.xlu1 %1159, %v689_v45  }
  0x12   :  { %1039 = vmatpush3.bf16.msra.mxu0 %v1174_v16  ;;  %v1206_v43 = vld [vmem:[%s1689_s0 + $0x4c] ss:$16 sps:$4 sm:$0xff]  }
  0x13   :  { %1079 = vmatpush3.bf16.msra.mxu1 %v1175_v17  ;;  %1040 = vmatprep.subr.bf16.mxu0 %v1176_v18 }
  0x14   :  { %1080 = vmatprep.subr.bf16.mxu1 %v1177_v19 }
  0x16   :  { %1041 = vmatpush3.bf16.msra.mxu0 %v1178_v20 }
  0x17   :  { %1081 = vmatpush3.bf16.msra.mxu1 %v1179_v21  ;;  %1042 = vmatprep.subr.bf16.mxu0 %v1180_v22 }
  0x18   :  { %1082 = vmatprep.subr.bf16.mxu1 %v1181_v23 }
  0x1a   :  { %1043 = vmatpush3.bf16.msra.mxu0 %v1182_v24 }
  0x1b   :  { %1083 = vmatpush3.bf16.msra.mxu1 %v1183_v25  ;;  %1044 = vmatprep.subr.bf16.mxu0 %v1184_v26 }
  0x1c   :  { %1084 = vmatprep.subr.bf16.mxu1 %v1185_v27 }
  0x1e   :  { %1045 = vmatpush3.bf16.msra.mxu0 %v1186_v28 }
  0x1f   :  { %1085 = vmatpush3.bf16.msra.mxu1 %v1187_v29  ;;  %1046 = vmatprep.subr.bf16.mxu0 %v1188_v30 }
  0x20   :  { %1086 = vmatprep.subr.bf16.mxu1 %v1189_v31 }
  0x22   :  { %1047 = vmatpush3.bf16.msra.mxu0 %v1190_v32 }
  0x23   :  { %1087 = vmatpush3.bf16.msra.mxu1 %v1191_v33 }
  0x25   :  { %415 = vmatmul.mubr.bf16.vlgmr.msra.gmra.mrb[0].mxu0 %v1192_v34 }
  0x26   :  { %480 = vmatmul.mubr.bf16.vlgmr.msra.gmra.mrb[0].mxu1 %v1195_v36  ;;  %422 = vmatprep.mubr.bf16.mxu0 %v1198_v38 }
  0x27   :  { %487 = vmatprep.mubr.bf16.mxu1 %v1200_v39 }
  0x2d   :  { %423 = vmatmul.mubr.bf16.gmra.mrb[4].mxu0 %v1202_v40 }
  0x2e   :  { %488 = vmatmul.mubr.bf16.gmra.mrb[4].mxu1 %v1203_v41  ;;  %430 = vmatprep.mubr.bf16.mxu0 %v1204_v42 }
  0x2f   :  { %495 = vmatprep.mubr.bf16.mxu1 %v1206_v43 }
  0x30   :  { %14 = vsyncpa [#allocation4], 0  ;;  %v1208_v47 = vld [vmem:[%s1689_s0 + $0x40] ss:$16 sps:$4 sm:$0xff]   ;;  %v690_v48 = vld [vmem:[%s1692_s3 + $0x8] sm:$0xff]  ;;  %vm512_vm0 = vcmask 261120  }
  0x31   :  { %v638_v49 = vld [vmem:[%s1691_s2 + $0x28] sm:$0xff]  ;;  %v1210_v51 = vld [vmem:[%s1689_s0 + $0x64] ss:$16 sps:$4 sm:$0xff]   ;;  %704 = vperm.xlu1 %1159, %v690_v48   ;;  %v1214_v55 = vld [vmem:[%s1689_s0 + $0x60] ss:$16 sps:$4 sm:$0xff]   ;;  %vm918_vm9 = vcmask 15360  }
  0x32   :  { %v1209_v50 = vld [vmem:[%s1689_s0 + $0x48] ss:$16 sps:$4 sm:$0xff]   ;;  %v1212_v52 = vld [vmem:[%s1689_s0 + $0x6c] ss:$16 sps:$4 sm:$0xff]   ;;  %668 = vperm.xlu0 %1158, %v638_v49   ;;  %v635_v53 = vld [vmem:[%s1691_s2 + $0x10] sm:$0xff]  ;;  %vm960_vm10 = vcmask 8192  }
  0x33   :  { %v694_v54 = vld [vmem:[%s1692_s3 + $0x28] sm:$0xff]  ;;  %v636_v56 = vld [vmem:[%s1691_s2 + $0x18] sm:$0xff]  ;;  %v691_v59 = vld [vmem:[%s1692_s3 + $0x10] sm:$0xff] }
  0x34   :  { %v640_v57 = vld [vmem:[%s1691_s2 + $0x38] sm:$0xff]  ;;  %v637_v61 = vld [vmem:[%s1691_s2 + $0x20] sm:$0xff]  ;;  %v639_v63 = vld [vmem:[%s1691_s2 + $0x30] sm:$0xff] }
  0x35   :  { %431 = vmatmul.mubr.bf16.gmra.mrb[8].mxu0 %v1208_v47  ;;  %653 = vperm.xlu1 %1159, %v635_v53   ;;  %v1215_v58 = vld [vmem:[%s1689_s0 + $0x68] ss:$16 sps:$4 sm:$0xff]   ;;  %v693_v62 = vld [vmem:[%s1692_s3 + $0x20] sm:$0xff] }
  0x36   :  { %496 = vmatmul.mubr.bf16.gmra.mrb[8].mxu1 %v1209_v50  ;;  %438 = vmatprep.mubr.bf16.mxu0 %v1210_v51  ;;  %v692_v60 = vld [vmem:[%s1692_s3 + $0x18] sm:$0xff] }
  0x37   :  { %503 = vmatprep.mubr.bf16.mxu1 %v1212_v52  ;;  %724 = vperm.xlu0 %1158, %v694_v54  }
  0x39   :  { %658 = vperm.xlu1 %1159, %v636_v56  }
  0x3b   :  { %678 = vperm.xlu0 %1158, %v640_v57  }
  0x3d   :  { %439 = vmatmul.mubr.bf16.gmra.mrb[12].mxu0 %v1214_v55  ;;  %709 = vperm.xlu1 %1159, %v691_v59  }
  0x3e   :  { %504 = vmatmul.mubr.bf16.gmra.mrb[12].mxu1 %v1215_v58 }
  0x41   :  { %714 = vperm.xlu1 %1159, %v692_v60  }
  0x45   :  { %663 = vperm.xlu1 %1159, %v637_v61  }
  0x49   :  { %719 = vperm.xlu1 %1159, %v693_v62  }
  0x4d   :  { %673 = vperm.xlu1 %1159, %v639_v63  }
  0xf8   :  { %v1048_v0 = vpop.f32.mrb[0].mxu0 }
  0xf9   :  { %v1088_v1 = vpop.f32.mrb[0].mxu1  ;;  %v1049_v2 = vpop.f32.mrb[1].mxu0 }
  0xfa   :  { %v1050_v3 = vadd.f32 %v1049_v2, %v1048_v0  ;;  %v1089_v4 = vpop.f32.mrb[1].mxu1  ;;  %v1051_v5 = vpop.f32.mrb[2].mxu0 }
  0xfb   :  { %v1090_v6 = vadd.f32 %v1089_v4, %v1088_v1  ;;  %v1091_v7 = vpop.f32.mrb[2].mxu1  ;;  %v1052_v8 = vpop.f32.mrb[3].mxu0 }
  0xfc   :  { %v1053_v9 = vadd.f32 %v1052_v8, %v1051_v5  ;;  %v1092_v10 = vpop.f32.mrb[3].mxu1 }
  0xfd   :  { %v1491_v11 = vadd.f32 %v1090_v6, %v1050_v3  ;;  %v1093_v12 = vadd.f32 %v1092_v10, %v1091_v7 }
  0xff   :  { %v1493_v13 = vadd.f32 %v1093_v12, %v1053_v9  ;;  %v513_v14 = vsel %vm512_vm0, %v1491_v11, 0.0  ;;  %v537_v15 = vmul.f32 %v1491_v11, %v1491_v11 }
 0x100   :  { %514 = vadd.xlane.f32.xlu0 %v513_v14  ;;  %v1054_v16 = vpop.f32.mrb[4].mxu0 }
 0x101   :  { %v1094_v17 = vpop.f32.mrb[4].mxu1  ;;  %v1055_v18 = vpop.f32.mrb[5].mxu0  ;;  %v545_v19 = vsel %vm512_vm0, %v537_v15, 0.0  ;;  %v538_v20 = vmul.f32 %v1493_v13, %v1493_v13  ;;  %v516_v27 = vsel %vm512_vm0, %v1493_v13, 0.0 }
 0x102   :  { %v1056_v21 = vadd.f32 %v1055_v18, %v1054_v16  ;;  %v1095_v22 = vpop.f32.mrb[5].mxu1  ;;  %546 = vadd.xlane.f32.xlu1 %v545_v19  ;;  %v1057_v23 = vpop.f32.mrb[6].mxu0  ;;  %v785_v18 = vld [vmem:[%s1694_s5] sm:$0xff]  ;;  %v786_v19 = vld [vmem:[%s1694_s5 + $0x8] sm:$0xff] }
 0x103   :  { %v1096_v24 = vadd.f32 %v1095_v22, %v1094_v17  ;;  %v1097_v25 = vpop.f32.mrb[6].mxu1  ;;  %v1058_v26 = vpop.f32.mrb[7].mxu0  ;;  %v548_v32 = vsel %vm512_vm0, %v538_v20, 0.0  ;;  %v1144_v20 = vpack.c.bf16 %v786_v19, %v785_v18  ;;  %v788_v22 = vld [vmem:[%s1694_s5 + $0x18] sm:$0xff] }
 0x104   :  { %v1059_v28 = vadd.f32 %v1058_v26, %v1057_v23  ;;  %v1098_v29 = vpop.f32.mrb[7].mxu1  ;;  %517 = vadd.xlane.f32.xlu0 %v516_v27  ;;  %v940_v26 = vld [vmem:[#allocation2] sm:$0x1]  ;;  %v1565_v27 = vpop.permute.xlu1 %648 }
 0x105   :  { %v1504_v30 = vadd.f32 %v1096_v24, %v1056_v21  ;;  %v1099_v31 = vadd.f32 %v1098_v29, %v1097_v25  ;;  %1145 = vmatprep.subr.bf16.mxu0 %v1144_v20  ;;  %1152 = vmatprep.subr.bf16.mxu1 %v1144_v20  ;;  %v787_v21 = vld [vmem:[%s1694_s5 + $0x10] sm:$0xff]  ;;  %v696_v25 = vld [vmem:[%s1692_s3 + $0x38] sm:$0xff] }
 0x106   :  { %549 = vadd.xlane.f32.xlu1 %v548_v32  ;;  %1147 = vmatpush3.bf16.msra.mxu0 %v1144_v20  ;;  %v1148_v23 = vpack.c.bf16 %v788_v22, %v787_v21  ;;  %v695_v24 = vld [vmem:[%s1692_s3 + $0x30] sm:$0xff] }
 0x107   :  { %v1507_v33 = vadd.f32 %v1099_v31, %v1059_v28  ;;  %v519_v34 = vsel %vm512_vm0, %v1504_v30, 0.0  ;;  %v539_v35 = vmul.f32 %v1504_v30, %v1504_v30  ;;  %1154 = vmatpush3.bf16.msra.mxu1 %v1144_v20 }
 0x108   :  { %520 = vadd.xlane.f32.xlu0 %v519_v34  ;;  %v1060_v36 = vpop.f32.mrb[8].mxu0  ;;  %1149 = vmatprep.subr.bf16.mxu0 %v1148_v23  ;;  %v1567_v28 = vpop.permute.xlu1 %699 }
 0x109   :  { %v1100_v37 = vpop.f32.mrb[8].mxu1  ;;  %v1061_v38 = vpop.f32.mrb[9].mxu0  ;;  %v522_v39 = vsel %vm512_vm0, %v1507_v33, 0.0  ;;  %v540_v40 = vmul.f32 %v1507_v33, %v1507_v33  ;;  %v551_v47 = vsel %vm512_vm0, %v539_v35, 0.0  ;;  %1153 = vmatprep.subr.bf16.mxu1 %v1148_v23 }
 0x10a   :  { %v1062_v41 = vadd.f32 %v1061_v38, %v1060_v36  ;;  %v1101_v42 = vpop.f32.mrb[9].mxu1  ;;  %523 = vadd.xlane.f32.xlu1 %v522_v39  ;;  %v1063_v43 = vpop.f32.mrb[10].mxu0  ;;  %1151 = vmatpush3.bf16.msra.mxu0 %v1148_v23 }
 0x10b   :  { %v1102_v44 = vadd.f32 %v1101_v42, %v1100_v37  ;;  %v1103_v45 = vpop.f32.mrb[10].mxu1  ;;  %v1064_v46 = vpop.f32.mrb[11].mxu0  ;;  %v554_v52 = vsel %vm512_vm0, %v540_v40, 0.0  ;;  %1155 = vmatpush3.bf16.msra.mxu1 %v1148_v23 }
 0x10c   :  { %v1065_v48 = vadd.f32 %v1064_v46, %v1063_v43  ;;  %v1104_v49 = vpop.f32.mrb[11].mxu1  ;;  %552 = vadd.xlane.f32.xlu0 %v551_v47  ;;  %v1569_v29 = vpop.permute.xlu1 %704 }
 0x10d   :  { %v1518_v50 = vadd.f32 %v1102_v44, %v1062_v41  ;;  %v1105_v51 = vadd.f32 %v1104_v49, %v1103_v45  ;;  %v644_v35 = vpop.permute.xlu0 %643 }
 0x10e   :  { %555 = vadd.xlane.f32.xlu1 %v554_v52 }
 0x10f   :  { %v1521_v53 = vadd.f32 %v1105_v51, %v1065_v48  ;;  %v525_v54 = vsel %vm512_vm0, %v1518_v50, 0.0  ;;  %v541_v55 = vmul.f32 %v1518_v50, %v1518_v50 }
 0x110   :  { %526 = vadd.xlane.f32.xlu0 %v525_v54  ;;  %v1066_v56 = vpop.f32.mrb[12].mxu0  ;;  %v1571_v31 = vpop.permute.xlu1 %653 }
 0x111   :  { %v1106_v57 = vpop.f32.mrb[12].mxu1  ;;  %v1067_v58 = vpop.f32.mrb[13].mxu0  ;;  %v528_v59 = vsel %vm512_vm0, %v1521_v53, 0.0  ;;  %v542_v60 = vmul.f32 %v1521_v53, %v1521_v53  ;;  %v557_v3 = vsel %vm512_vm0, %v541_v55, 0.0 }
 0x112   :  { %v1068_v61 = vadd.f32 %v1067_v58, %v1066_v56  ;;  %v1107_v62 = vpop.f32.mrb[13].mxu1  ;;  %529 = vadd.xlane.f32.xlu1 %v528_v59  ;;  %v1069_v63 = vpop.f32.mrb[14].mxu0 }
 0x113   :  { %v1108_v0 = vadd.f32 %v1107_v62, %v1106_v57  ;;  %v1109_v1 = vpop.f32.mrb[14].mxu1  ;;  %v1070_v2 = vpop.f32.mrb[15].mxu0  ;;  %v560_v8 = vsel %vm512_vm0, %v542_v60, 0.0 }
 0x114   :  { %v1071_v4 = vadd.f32 %v1070_v2, %v1069_v63  ;;  %v1110_v5 = vpop.f32.mrb[15].mxu1  ;;  %558 = vadd.xlane.f32.xlu0 %v557_v3  ;;  %v1573_v32 = vpop.permute.xlu1 %658 }
 0x115   :  { %v1532_v6 = vadd.f32 %v1108_v0, %v1068_v61  ;;  %v1111_v7 = vadd.f32 %v1110_v5, %v1109_v1  ;;  %v1579_v37 = vpop.permute.xlu0 %668 }
 0x116   :  { %561 = vadd.xlane.f32.xlu1 %v560_v8 }
 0x117   :  { %v1535_v9 = vadd.f32 %v1111_v7, %v1071_v4  ;;  %v531_v10 = vsel %vm512_vm0, %v1532_v6, 0.0  ;;  %v543_v12 = vmul.f32 %v1532_v6, %v1532_v6 }
 0x118   :  { %532 = vadd.xlane.f32.xlu0 %v531_v10  ;;  %v1575_v34 = vpop.permute.xlu1 %709 }
 0x119   :  { %v534_v14 = vsel %vm512_vm0, %v1535_v9, 0.0  ;;  %v544_v15 = vmul.f32 %v1535_v9, %v1535_v9  ;;  %v563_v16 = vsel %vm512_vm0, %v543_v12, 0.0  ;;  %v1583_v39 = vpop.permute.xlu0 %724 }
 0x11a   :  { %535 = vadd.xlane.f32.xlu1 %v534_v14 }
 0x11b   :  { %v566_v17 = vsel %vm512_vm0, %v544_v15, 0.0 }
 0x11c   :  { %564 = vadd.xlane.f32.xlu0 %v563_v16  ;;  %v1577_v36 = vpop.permute.xlu1 %714 }
 0x11d   :  { %v1587_v41 = vpop.permute.xlu0 %678 }
 0x11e   :  { %567 = vadd.xlane.f32.xlu1 %v566_v17 }
 0x120   :  { %v1581_v38 = vpop.permute.xlu1 %663 }
 0x124   :  { %v1585_v40 = vpop.permute.xlu1 %719 }
 0x128   :  { %v1589_v42 = vpop.permute.xlu1 %673 }
 0x12f   :  { %729 = vperm.xlu1 %1159, %v695_v24  }
 0x132   :  { %734 = vperm.xlu0 %1158, %v696_v25  }
 0x133   :  { %943 = vperm.xlu1 %1159, %v940_v26  }
 0x18d   :  { %v515_v43 = vpop.xlane.xlu0 %514 }
 0x18e   :  { %v569_v44 = vmul.f32 0.03125, %v515_v43 }
 0x18f   :  { %v547_v45 = vpop.xlane.xlu1 %546 }
 0x190   :  { %v585_v46 = vmul.f32 %v569_v44, %v569_v44  ;;  %v577_v47 = vmul.f32 0.03125, %v547_v45  ;;  %v601_v14 = vsub.f32 %v1491_v11, %v569_v44 }
 0x191   :  { %v518_v48 = vpop.xlane.xlu0 %517 }
 0x192   :  { %v593_v49 = vsub.f32 %v577_v47, %v585_v46  ;;  %v570_v51 = vmul.f32 0.03125, %v518_v48 }
 0x193   :  { %v550_v52 = vpop.xlane.xlu1 %549 }
 0x194   :  { %v609_v54 = vadd.f32 1e-05, %v593_v49  ;;  %v586_v55 = vmul.f32 %v570_v51, %v570_v51  ;;  %v578_v56 = vmul.f32 0.03125, %v550_v52  ;;  %v602_v23 = vsub.f32 %v1493_v13, %v570_v51 }
 0x195   :  { %v521_v57 = vpop.xlane.xlu0 %520 }
 0x196   :  { %1216 = vrsqrt.f32 %v609_v54  ;;  %v594_v58 = vsub.f32 %v578_v56, %v586_v55  ;;  %v571_v59 = vmul.f32 0.03125, %v521_v57 }
 0x197   :  { %v524_v60 = vpop.xlane.xlu1 %523 }
 0x198   :  { %v610_v61 = vadd.f32 1e-05, %v594_v58  ;;  %v1591_v62 = vmul.f32 0.03125, %v524_v60  ;;  %v587_v0 = vmul.f32 %v571_v59, %v571_v59  ;;  %v603_v57 = vsub.f32 %v1504_v30, %v571_v59 }
 0x199   :  { %v553_v63 = vpop.xlane.xlu0 %552 }
 0x19a   :  { %1218 = vrsqrt.f32 %v610_v61  ;;  %v579_v1 = vmul.f32 0.03125, %v553_v63  ;;  %v588_v3 = vmul.f32 %v1591_v62, %v1591_v62 }
 0x19b   :  { %v556_v2 = vpop.xlane.xlu1 %555 }
 0x19c   :  { %v595_v4 = vsub.f32 %v579_v1, %v587_v0  ;;  %v580_v5 = vmul.f32 0.03125, %v556_v2  ;;  %v604_v1 = vsub.f32 %v1507_v33, %v1591_v62 }
 0x19d   :  { %v527_v7 = vpop.xlane.xlu0 %526 }
 0x19e   :  { %v611_v8 = vadd.f32 1e-05, %v595_v4  ;;  %v596_v10 = vsub.f32 %v580_v5, %v588_v3  ;;  %v1595_v12 = vmul.f32 0.03125, %v527_v7  ;;  %v770_v7 = vld [vmem:[%s1693_s4 + $0x8] sm:$0xff] }
 0x19f   :  { %v530_v15 = vpop.xlane.xlu1 %529 }
 0x1a0   :  { %v1217_v16 = vpop.eup %1216  ;;  %1220 = vrsqrt.f32 %v611_v8  ;;  %v612_v17 = vadd.f32 1e-05, %v596_v10  ;;  %v1598_v19 = vmul.f32 0.03125, %v530_v15  ;;  %v589_v21 = vmul.f32 %v1595_v12, %v1595_v12 }
 0x1a1   :  { %v625_v18 = vmul.f32 %v1217_v16, %v601_v14  ;;  %v559_v20 = vpop.xlane.xlu0 %558 }
 0x1a2   :  { %1222 = vrsqrt.f32 %v612_v17  ;;  %v581_v22 = vmul.f32 0.03125, %v559_v20  ;;  %v590_v11 = vmul.f32 %v1598_v19, %v1598_v19  ;;  %v605_v20 = vsub.f32 %v1518_v50, %v1595_v12  ;;  %v772_v50 = vld [vmem:[%s1693_s4 + $0x18] sm:$0xff] }
 0x1a3   :  { %v562_v24 = vpop.xlane.xlu1 %561  ;;  %v681_v25 = vmul.f32 %v644_v35, %v625_v18  ;;  %v769_v35 = vld [vmem:[%s1693_s4] sm:$0xff] }
 0x1a4   :  { %v1219_v26 = vpop.eup %1218  ;;  %v597_v43 = vsub.f32 %v581_v22, %v589_v21  ;;  %v582_v44 = vmul.f32 0.03125, %v562_v24 }
 0x1a5   :  { %v626_v45 = vmul.f32 %v1219_v26, %v602_v23  ;;  %v533_v46 = vpop.xlane.xlu0 %532  ;;  %v737_v47 = vadd.f32 %v1567_v28, %v681_v25 }
 0x1a6   :  { %v613_v48 = vadd.f32 1e-05, %v597_v43  ;;  %v598_v49 = vsub.f32 %v582_v44, %v590_v11  ;;  %v1606_v52 = vmul.f32 0.03125, %v533_v46 }
 0x1a7   :  { %v682_v54 = vmul.f32 %v1565_v27, %v626_v45  ;;  %v536_v55 = vpop.xlane.xlu1 %535  ;;  %vm745_vm1 = vcmp.ge.f32.partialorder %v737_v47, 0.0  ;;  %v753_v13 = vmul.f32 0.2, %v737_v47 }
 0x1a8   :  { %1224 = vrsqrt.f32 %v613_v48  ;;  %v614_v51 = vadd.f32 1e-05, %v598_v49  ;;  %v1614_v28 = vmul.f32 0.03125, %v536_v55  ;;  %v591_v27 = vmul.f32 %v1606_v52, %v1606_v52 }
 0x1a9   :  { %v738_v56 = vadd.f32 %v1569_v29, %v682_v54  ;;  %v565_v58 = vpop.xlane.xlu0 %564  ;;  %v761_v60 = vsel %vm745_vm1, %v737_v47, %v753_v13  ;;  %v607_v46 = vsub.f32 %v1532_v6, %v1606_v52 }
 0x1aa   :  { %v1221_v61 = vpop.eup %1220  ;;  %1226 = vrsqrt.f32 %v614_v51  ;;  %v583_v63 = vmul.f32 0.03125, %v565_v58  ;;  %v777_v0 = vmul.f32 %v769_v35, %v761_v60  ;;  %v592_v30 = vmul.f32 %v1614_v28, %v1614_v28  ;;  %v775_v58 = vld [vmem:[%s1693_s4 + $0x30] sm:$0xff] }
 0x1ab   :  { %v627_v2 = vmul.f32 %v1221_v61, %v603_v57  ;;  %v568_v3 = vpop.xlane.xlu1 %567  ;;  %vm746_vm2 = vcmp.ge.f32.partialorder %v738_v56, 0.0  ;;  %v754_v5 = vmul.f32 0.2, %v738_v56  ;;  %v608_v49 = vsub.f32 %v1535_v9, %v1614_v28 }
 0x1ac   :  { %v1223_v29 = vpop.eup %1222  ;;  %v599_v59 = vsub.f32 %v583_v63, %v591_v27  ;;  %v584_v4 = vmul.f32 0.03125, %v568_v3  ;;  %1132 = vmatprep.mubr.msk.f32.mxu0 %vm512_vm0, %v777_v0  ;;  %v776_v27 = vld [vmem:[%s1693_s4 + $0x38] sm:$0xff] }
 0x1ad   :  { %v628_v8 = vmul.f32 %v1223_v29, %v604_v1  ;;  %v683_v10 = vmul.f32 %v1571_v31, %v627_v2  ;;  %v762_v14 = vsel %vm746_vm2, %v738_v56, %v754_v5  ;;  %v771_v31 = vld [vmem:[%s1693_s4 + $0x10] sm:$0xff] }
 0x1ae   :  { %v615_v33 = vadd.f32 1e-05, %v599_v59  ;;  %v600_v62 = vsub.f32 %v584_v4, %v592_v30  ;;  %v778_v15 = vmul.f32 %v770_v7, %v762_v14 }
 0x1af   :  { %v739_v16 = vadd.f32 %v1575_v34, %v683_v10  ;;  %v684_v17 = vmul.f32 %v1573_v32, %v628_v8  ;;  %v606_v34 = vsub.f32 %v1521_v53, %v1598_v19  ;;  %v730_v51 = vpop.permute.xlu1 %729 }
 0x1b0   :  { %1228 = vrsqrt.f32 %v615_v33  ;;  %v616_v18 = vadd.f32 1e-05, %v600_v62  ;;  %1133 = vmatmul.mubr.msk.f32.vlgmr.msra.gmra.mrb[16].mxu0 %vm512_vm0, %v778_v15 }
 0x1b1   :  { %vm747_vm3 = vcmp.ge.f32.partialorder %v739_v16, 0.0  ;;  %v755_v21 = vmul.f32 0.2, %v739_v16  ;;  %v740_v22 = vadd.f32 %v1577_v36, %v684_v17  ;;  %v735_v28 = vpop.permute.xlu0 %734 }
 0x1b2   :  { %v1225_v23 = vpop.eup %1224  ;;  %1230 = vrsqrt.f32 %v616_v18 }
 0x1b3   :  { %v629_v32 = vmul.f32 %v1225_v23, %v605_v20  ;;  %v763_v24 = vsel %vm747_vm3, %v739_v16, %v755_v21  ;;  %vm748_vm4 = vcmp.ge.f32.partialorder %v740_v22, 0.0  ;;  %v756_v25 = vmul.f32 0.2, %v740_v22 }
 0x1b4   :  { %v1227_v12 = vpop.eup %1226  ;;  %v779_v26 = vmul.f32 %v771_v31, %v763_v24 }
 0x1b5   :  { %v630_v11 = vmul.f32 %v1227_v12, %v606_v34  ;;  %v764_v43 = vsel %vm748_vm4, %v740_v22, %v756_v25  ;;  %v685_v44 = vmul.f32 %v1581_v38, %v629_v32  ;;  %v773_v38 = vld [vmem:[%s1693_s4 + $0x20] sm:$0xff]  ;;  %v946_v34 = vlaneseq }
 0x1b6   :  { %1135 = vmatprep.mubr.msk.f32.mxu0 %vm512_vm0, %v779_v26  ;;  %v780_v36 = vmul.f32 %v772_v50, %v764_v43  ;;  %v944_v43 = vpop.permute.xlu1 %943 }
 0x1b7   :  { %v686_v53 = vmul.f32 %v1579_v37, %v630_v11  ;;  %v741_v19 = vadd.f32 %v1585_v40, %v685_v44  ;;  %v947_v25 = vshrl.u32 %v946_v34, 7 }
 0x1b8   :  { %1136 = vmatmul.mubr.msk.f32.gmra.mrb[18].mxu0 %vm512_vm0, %v780_v36 }
 0x1b9   :  { %v742_v45 = vadd.f32 %v1583_v39, %v686_v53  ;;  %vm749_vm5 = vcmp.ge.f32.partialorder %v741_v19, 0.0  ;;  %v757_v47 = vmul.f32 0.2, %v741_v19  ;;  %v774_v39 = vld [vmem:[%s1693_s4 + $0x28] sm:$0xff]  ;;  %v948_v26 = vsub.s32 0, %v947_v25  ;;  %s1261_s4 = smov [#allocation3]  }
 0x1ba   :  { %v1229_v48 = vpop.eup %1228  ;;  %s968_s1 = sshll.u32 %s1261_s4, 4  ;;  %s969_s1 = int_to_ptr.vmem [resolvable:$true] %s968_s1 }
 0x1bb   :  { %v631_v37 = vmul.f32 %v1229_v48, %v607_v46  ;;  %v765_v54 = vsel %vm749_vm5, %v741_v19, %v757_v47  ;;  %vm750_vm6 = vcmp.ge.f32.partialorder %v742_v45, 0.0  ;;  %v758_v40 = vmul.f32 0.2, %v742_v45  ;;  %s1236_s2 = scalar_lea.vmem %s969_s1, 16  ;;  %s1240_s26 = scalar_lea.vmem %s969_s1, 32 }
 0x1bc   :  { %v1231_v55 = vpop.eup %1230  ;;  %v781_v6 = vmul.f32 %v773_v38, %v765_v54  ;;  %v949_v36 = vrot.slane %v944_v43, %v948_v26  ;;  %p1237_p0 = scmp.ne.s32.totalorder %s969_s1, %s1236_s2  ;;  %p1241_p1 = scmp.lt.s32.totalorder %s969_s1, %s969_s1 }
 0x1bd   :  { %v687_v52 = vmul.f32 %v1589_v42, %v631_v37  ;;  %v632_v13 = vmul.f32 %v1231_v55, %v608_v49  ;;  %v766_v35 = vsel %vm750_vm6, %v742_v45, %v758_v40  ;;  %p1242_p2 = scmp.lt.s32.totalorder %s1240_s26, %s1236_s2 }
 0x1be   :  { %1138 = vmatprep.mubr.msk.f32.mxu1 %vm512_vm0, %v781_v6  ;;  %v782_v56 = vmul.f32 %v774_v39, %v766_v35 }
 0x1bf   :  { %v743_v57 = vadd.f32 %v730_v51, %v687_v52  ;;  %v688_v9 = vmul.f32 %v1587_v41, %v632_v13  ;;  %p1243_p3 = por %p1242_p2, %p1241_p1 }
 0x1c0   :  { %1139 = vmatmul.mubr.msk.f32.vlgmr.msra.gmra.mrb[16].mxu1 %vm512_vm0, %v782_v56 }
 0x1c1   :  { %vm751_vm7 = vcmp.ge.f32.partialorder %v743_v57, 0.0  ;;  %v759_v60 = vmul.f32 0.2, %v743_v57  ;;  %v744_v61 = vadd.f32 %v735_v28, %v688_v9  ;;  %p1244_p4 = pnand %p1243_p3, %p1237_p0 }
 0x1c3   :  { %v767_v42 = vsel %vm751_vm7, %v743_v57, %v759_v60  ;;  %vm752_vm8 = vcmp.ge.f32.partialorder %v744_v61, 0.0  ;;  %v760_v63 = vmul.f32 0.2, %v744_v61 }
 0x1c4   :  { %v783_v0 = vmul.f32 %v775_v58, %v767_v42 }
 0x1c5   :  { %v768_v1 = vsel %vm752_vm8, %v744_v61, %v760_v63 }
 0x1c6   :  { %v784_v41 = vmul.f32 %v776_v27, %v768_v1  ;;  %1141 = vmatprep.mubr.msk.f32.mxu1 %vm512_vm0, %v783_v0 }
 0x1c8   :  { %1142 = vmatmul.mubr.msk.f32.gmra.mrb[18].mxu1 %vm512_vm0, %v784_v41 }
 0x283   :  { %v1134_v2 = vpop.f32.mrb[16].mxu0 }
 0x284   :  { %v920_v3 = vsel %vm918_vm9, %v1134_v2, 0.0  ;;  %v879_v29 = vpop.f32.mrb[17].mxu0 }
 0x285   :  { %v919_v30 = vsel %vm918_vm9, %v879_v29, 0.0 }
 0x286   :  { %v921_v59 = vadd.f32 %v920_v3, %v919_v30 }
 0x28b   :  { %v1137_v4 = vpop.f32.mrb[18].mxu0 }
 0x28c   :  { %v889_v5 = vpop.f32.mrb[19].mxu0  ;;  %v924_v10 = vsel %vm918_vm9, %v1137_v4, 0.0 }
 0x28d   :  { %v922_v7 = vsel %vm918_vm9, %v889_v5, 0.0 }
 0x28e   :  { %v923_v8 = vadd.f32 %v922_v7, %v921_v59 }
 0x290   :  { %v925_v33 = vadd.f32 %v924_v10, %v923_v8 }
 0x293   :  { %v1140_v62 = vpop.f32.mrb[16].mxu1 }
 0x294   :  { %v899_v14 = vpop.f32.mrb[17].mxu1  ;;  %v928_v17 = vsel %vm918_vm9, %v1140_v62, 0.0 }
 0x295   :  { %v926_v15 = vsel %vm918_vm9, %v899_v14, 0.0 }
 0x296   :  { %v927_v16 = vadd.f32 %v926_v15, %v925_v33 }
 0x298   :  { %v929_v18 = vadd.f32 %v928_v17, %v927_v16 }
 0x29b   :  { %v1143_v20 = vpop.f32.mrb[18].mxu1 }
 0x29c   :  { %v909_v21 = vpop.f32.mrb[19].mxu1  ;;  %v932_v23 = vsel %vm918_vm9, %v1143_v20, 0.0 }
 0x29d   :  { %v930_v31 = vsel %vm918_vm9, %v909_v21, 0.0 }
 0x29e   :  { %v931_v22 = vadd.f32 %v930_v31, %v929_v18 }
 0x2a0   :  { %v933_v32 = vadd.f32 %v932_v23, %v931_v22 }
 0x2a2   :  { %v934_v24 = vrot.slane %v933_v32, 4 }
 0x2a4   :  { %v935_v50 = vadd.f32 %v934_v24, %v933_v32 }
 0x2a6   :  { %v936_v12 = vrot.slane %v935_v50, 2 }
 0x2a8   :  { %v937_v11 = vadd.f32 %v936_v12, %v935_v50 }
 0x2aa   :  { %v938_v44 = vrot.slane %v937_v11, 1 }
 0x2ac   :  { %v939_v53 = vadd.f32 %v938_v44, %v937_v11 }
 0x2ae   :  { %v950_v19 = vadd.f32 %v949_v36, %v939_v53 }
 0x2b0   :  { %v951_v45 = vand.u32 2147483647, %v950_v19  ;;  %vm957_vm11 = vcmp.ge.f32.partialorder %v950_v19, 0.0 }
 0x2b2   :  { %v952_v46 = vsub.f32 0.0, %v951_v45 }
 0x2b4   :  { %v953_v47 = vmul.f32 1.442695, %v952_v46 }
 0x2b6   :  { %1232 = vpow2.f32 %v953_v47 }
 0x2c0   :  { %v1233_v38 = vpop.eup %1232 }
 0x2c1   :  { %v955_v48 = vadd.f32 1.0, %v1233_v38 }
 0x2c3   :  { %1234 = vrcp.f32 %v955_v48 }
 0x2cd   :  { %v1235_v49 = vpop.eup %1234 }
 0x2ce   :  { %v958_v37 = vmul.f32 %v1235_v49, %v1233_v38 }
 0x2d0   :  { %v959_v54 = vsel %vm957_vm11, %v1235_v49, %v958_v37 }
 0x2d1   :  { %961 = vst.msk [vmem:[#allocation3] sm:$0x1] %vm960_vm10, %v959_v54 }
 0x2d2   :  { %1247 = shalt.err (!%p1244_p4)
}
 0x2d3   :  { %s1248_s29 = scalar_lea.hbm %s1696_s7, 16 }
 0x2d4   :  { %p1249_p5 = scmp.ne.s32.totalorder %s1696_s7, %s1248_s29  ;;  %p1252_p6 = scmp.lt.u32.totalorder %s1248_s29, %s1696_s7 }
 0x2d6   :  { %p1254_p7 = pnand %p1252_p6, %p1249_p5 }
 0x2d8   :  { %1257 = shalt.err (!%p1254_p7)
}
 0x2d9   :  { %971 = dma.vmem_to_hbm [thread:$0]  %s969_s1, 16, %s1696_s7, [#allocation4]  }
 0x2da   :  { %1258 = dma.done.wait [#allocation4], 16  }
 0x2db   :  { %1259 = vsyncadd [#allocation4], 4294967280 }
 0x2dc   :  { %975 = vsyncpa [#allocation4], 1 }

</bundles_post_ra>
